<compile_context>
chip_gen: v7x
topology: tpu7x:2x2x1
jax: 0.10.0
libtpu: 0.0.40
codegen_flags: <defaults>
</compile_context>

<pallas_src>
import functools
import math

import jax
import jax.numpy as jnp
from jax.experimental import pallas as pl
from jax.experimental.pallas import tpu as pltpu


# ------------------------- packed small-vector layout ---------------------- #
# All LayerNorm gammas/betas and linear biases live as rows of one (rows, 128) f32 array.
V_EMB_LN_G, V_EMB_LN_B = 0, 1          # width E
V_EMB_PROJ_B = 2                       # width H
V_ATTN_OUT_B = 3                       # width H
V_ATTN_LN_G, V_ATTN_LN_B = 4, 5        # width H
V_FFN_B = 6                            # width I
V_FFN_OUT_B = 7                        # width H
V_FULL_LN_G, V_FULL_LN_B = 8, 9        # width H
V_QA_B = 10                            # width 128 (only cols 0/1 real)
V_HW_B0 = 11                           # width 2H, one row per highway layer
NUM_VEC_ROWS = V_HW_B0 + 3             # 3 highway layers


# ------------------------------- fused kernel ------------------------------ #

def _fused_albert_highway_kernel(
    emb_ref, mask_ref, vec_ref,
    emb_proj_w_ref,
    q_w_ref, k_w_ref, v_w_ref, qkv_b_ref, attn_out_w_ref,
    ffn_w_ref, ffn_out_w_ref,
    hw_w_ref, qa_w_ref,
    out_ref,
    *, nH, d, H, E, I, num_layers, num_hw, eps):

  def ln(x, g, b):                                  # f32 LayerNorm (ALBERT eps = 1e-12)
    mu = jnp.mean(x, axis=-1, keepdims=True)
    var = jnp.mean(jnp.square(x - mu), axis=-1, keepdims=True)
    return (x - mu) * jax.lax.rsqrt(var + eps) * g + b

  def mm(x, w_bf16):                                # bf16 MXU operands, f32 accumulation
    return jnp.dot(x.astype(jnp.bfloat16), w_bf16, preferred_element_type=jnp.float32)

  def vec(row, width):                              # (1, width) slice of packed vectors
    return vec_ref[row:row + 1, :width]

  key_bias = mask_ref[0]                            # (1, S) additive key mask (0 / -1e4)

  # Embeddings: LayerNorm + factorized E -> H projection.
  x = ln(emb_ref[...], vec(V_EMB_LN_G, E), vec(V_EMB_LN_B, E))
  x = mm(x, emb_proj_w_ref[...]) + vec(V_EMB_PROJ_B, H)          # (S, H) f32

  # Shared ALBERT transformer layer repeated `num_layers` times (weight sharing).
  # fori_loop body reads the (VMEM-resident) weight refs at point of use.
  def albert_layer(_, x):
    # ---- self-attention: per-head, leading-axis indexed weights, bf16 MXU matmuls ----
    proj = vec(V_ATTN_OUT_B, H)                     # (1, H), broadcasts over rows
    x_bf = x.astype(jnp.bfloat16)
    for h in range(nH):
      # NOTE: 1/sqrt(d) is pre-folded into q_w / q-bias at init time.
      q_h = jnp.dot(x_bf, q_w_ref[h], preferred_element_type=jnp.float32) + qkv_b_ref[0, h]
      k_h = jnp.dot(x_bf, k_w_ref[h], preferred_element_type=jnp.float32) + qkv_b_ref[1, h]
      v_h = jnp.dot(x_bf, v_w_ref[h], preferred_element_type=jnp.float32) + qkv_b_ref[2, h]
      # QK^T without materializing a transpose: contract the feature dim of both operands.
      s_h = jax.lax.dot_general(
          q_h.astype(jnp.bfloat16), k_h.astype(jnp.bfloat16),
          (((1,), (1,)), ((), ())),
          preferred_element_type=jnp.float32) + key_bias          # (S, S) f32
      # f32 softmax with max-subtraction (keeps masked keys at exactly 0).
      s_h = s_h - jnp.max(s_h, axis=-1, keepdims=True)
      p_h = jnp.exp(s_h)
      p_h = p_h * pl.reciprocal(jnp.sum(p_h, axis=-1, keepdims=True), approx=True)
      ctx_h = jnp.dot(p_h.astype(jnp.bfloat16), v_h.astype(jnp.bfloat16),
                      preferred_element_type=jnp.float32)         # (S, d)
      # Output projection folded into the head loop: ctx @ W_o == sum_h ctx_h @ W_o[h]
      proj = proj + jnp.dot(ctx_h.astype(jnp.bfloat16), attn_out_w_ref[h],
                            preferred_element_type=jnp.float32)
    x = ln(x + proj, vec(V_ATTN_LN_G, H), vec(V_ATTN_LN_B, H))

    # ---- feed-forward (gelu_new) ----
    ffn = jax.nn.gelu(mm(x, ffn_w_ref[...]) + vec(V_FFN_B, I), approximate=True)
    x = ln(x + mm(ffn, ffn_out_w_ref[...]) + vec(V_FFN_OUT_B, H),
           vec(V_FULL_LN_G, H), vec(V_FULL_LN_B, H))
    return x

  x = jax.lax.fori_loop(0, num_layers, albert_layer, x)

  # Highway encoder: fused transform|gate matmul per layer.
  for i in range(num_hw):
    tg = mm(x, hw_w_ref[i]) + vec(V_HW_B0 + i, 2 * H)             # (S, 2H)
    t = jnp.maximum(tg[:, :H], 0.0)                 # relu(transform(x))
    g = jax.nn.sigmoid(tg[:, H:])                   # sigmoid(gate(x))
    x = g * t + (1.0 - g) * x

  # QA head: lane-padded to 128 columns so the HBM store is fully lane-dense.
  out_ref[...] = (mm(x, qa_w_ref[...]) + vec(V_QA_B, 128)).astype(out_ref.dtype)


# ------------------------------ model wrapper ------------------------------ #

CFG = dict(
    vocab=100, type_vocab=2, max_pos=16,
    emb=16, hidden=32, heads=4, inter=64, layers=2,
    highway_layers=3, qa_pad=128,
)


def init_params(key, cfg):
  E, H, I, P = cfg["emb"], cfg["hidden"], cfg["inter"], cfg["qa_pad"]
  nH = cfg["heads"]
  d = H // nH
  L = cfg["highway_layers"]
  scale = 1.0 / math.sqrt(d)
  keys = iter(jax.random.split(key, 24))

  def w(shape, dtype=jnp.bfloat16):
    return (0.02 * jax.random.normal(next(keys), shape, jnp.float32)).astype(dtype)

  # Packed small vectors (LN gammas/betas + biases), 128-lane padded.
  rnd = 0.02 * jax.random.normal(next(keys), (NUM_VEC_ROWS, 128), jnp.float32)
  vecs = jnp.zeros((NUM_VEC_ROWS, 128), jnp.float32)
  vecs = vecs.at[V_EMB_LN_G, :E].set(1.0)
  vecs = vecs.at[V_ATTN_LN_G, :H].set(1.0)
  vecs = vecs.at[V_FULL_LN_G, :H].set(1.0)
  for row, width in ([(V_EMB_PROJ_B, H), (V_ATTN_OUT_B, H), (V_FFN_B, I),
                      (V_FFN_OUT_B, H), (V_QA_B, 2)]
                     + [(V_HW_B0 + i, 2 * H) for i in range(L)]):
    vecs = vecs.at[row, :width].set(rnd[row, :width])

  # Per-head Q/K/V weights with head as leading axis; 1/sqrt(d) folded into the query path.
  q_w = (0.02 * scale * jax.random.normal(next(keys), (nH, H, d), jnp.float32)
         ).astype(jnp.bfloat16)
  k_w = w((nH, H, d))
  v_w = w((nH, H, d))
  qkv_b = 0.02 * jax.random.normal(next(keys), (3, nH, 1, d), jnp.float32)
  qkv_b = qkv_b.at[0].multiply(scale)               # fold scale into query bias too

  params = {
      "word_emb": w((cfg["vocab"], E), jnp.float32),
      "pos_emb": w((cfg["max_pos"], E), jnp.float32),
      "tok_emb": w((cfg["type_vocab"], E), jnp.float32),
      "vecs": vecs,
      "emb_proj_w": w((E, H)),
      "q_w": q_w, "k_w": k_w, "v_w": v_w, "qkv_b": qkv_b,
      "attn_out_w": w((nH, d, H)),                  # bf16, leading-axis indexed per head
      "ffn_w": w((H, I)),
      "ffn_out_w": w((I, H)),
      "hw_w": w((L, H, 2 * H)),                     # transform|gate fused per layer
  }
  # QA head padded to 128 output lanes; only columns 0 (start) and 1 (end) are real.
  qa_w = jnp.zeros((H, P), jnp.float32).at[:, :2].set(
      0.02 * jax.random.normal(next(keys), (H, 2), jnp.float32))
  params["qa_w"] = qa_w.astype(jnp.bfloat16)
  return params


def _const_map(nd):
  return lambda b: (0,) * nd


def albert_highway_forward(params, input_ids, attention_mask, token_type_ids, cfg=CFG):
  B, S = input_ids.shape
  E, H, I = cfg["emb"], cfg["hidden"], cfg["inter"]
  nH = cfg["heads"]
  d = H // nH
  BS = B * S

  # --- embeddings (dynamic gathers stay in JAX glue) ---
  pos_ids = jnp.arange(S)
  emb = (jnp.take(params["word_emb"], input_ids, axis=0)
         + jnp.take(params["pos_emb"], pos_ids, axis=0)[None, :, :]
         + jnp.take(params["tok_emb"], token_type_ids, axis=0))
  emb2 = emb.reshape(BS, E)

  # --- per-batch additive key mask, tiny (B, 1, S) instead of a (BS, BS) bias ---
  mask_bias = ((1.0 - attention_mask.astype(jnp.float32)) * -10000.0).reshape(B, 1, S)

  kernel = functools.partial(
      _fused_albert_highway_kernel,
      nH=nH, d=d, H=H, E=E, I=I,
      num_layers=cfg["layers"], num_hw=cfg["highway_layers"], eps=1e-12)

  weight_args = (params["vecs"], params["emb_proj_w"],
                 params["q_w"], params["k_w"], params["v_w"], params["qkv_b"],
                 params["attn_out_w"], params["ffn_w"], params["ffn_out_w"],
                 params["hw_w"], params["qa_w"])

  in_specs = [
      pl.BlockSpec((S, E), lambda b: (b, 0)),          # activations for batch b
      pl.BlockSpec((1, 1, S), lambda b: (b, 0, 0)),    # key mask for batch b
  ] + [pl.BlockSpec(a.shape, _const_map(a.ndim)) for a in weight_args]

  logits_pad = pl.pallas_call(
      kernel,
      out_shape=jax.ShapeDtypeStruct((BS, cfg["qa_pad"]), jnp.float32),
      grid=(B,),
      in_specs=in_specs,
      out_specs=pl.BlockSpec((S, cfg["qa_pad"]), lambda b: (b, 0)),
      compiler_params=pltpu.CompilerParams(dimension_semantics=("parallel",)),
  )(emb2, mask_bias, *weight_args)

  start_logits = logits_pad[:, 0].reshape(B, S)
  end_logits = logits_pad[:, 1].reshape(B, S)
  return start_logits, end_logits


# ---------------------------------- main ----------------------------------- #

if __name__ == "__main__":
  key = jax.random.PRNGKey(0)
  B, S = 2, 8

  params = init_params(jax.random.PRNGKey(42), CFG)

  k1, k2 = jax.random.split(key)
  input_ids = jax.random.randint(k1, (B, S), 0, CFG["vocab"], dtype=jnp.int32)
  token_type_ids = jax.random.randint(k2, (B, S), 0, CFG["type_vocab"], dtype=jnp.int32)
  attention_mask = jnp.ones((B, S), jnp.int32)

  fwd = jax.jit(albert_highway_forward)
  start_logits, end_logits = fwd(params, input_ids, attention_mask, token_type_ids)
  jax.block_until_ready((start_logits, end_logits))

  assert start_logits.shape == (B, S) and end_logits.shape == (B, S)
  assert jnp.all(jnp.isfinite(start_logits)) and jnp.all(jnp.isfinite(end_logits))
  print("KERNEL_OK")
</pallas_src>

<mosaic_0001>
module attributes {stable_mosaic.version = 11 : i64} {
  func.func @_fused_albert_highway_kernel(%arg0: i32, %arg1: memref<8x16xf32, #tpu.memory_space<vmem>>, %arg2: memref<1x1x8xf32, #tpu.memory_space<vmem>>, %arg3: memref<14x128xf32, #tpu.memory_space<vmem>>, %arg4: memref<16x32xbf16, #tpu.memory_space<vmem>>, %arg5: memref<4x32x8xbf16, #tpu.memory_space<vmem>>, %arg6: memref<4x32x8xbf16, #tpu.memory_space<vmem>>, %arg7: memref<4x32x8xbf16, #tpu.memory_space<vmem>>, %arg8: memref<3x4x1x8xf32, #tpu.memory_space<vmem>>, %arg9: memref<4x8x32xbf16, #tpu.memory_space<vmem>>, %arg10: memref<32x64xbf16, #tpu.memory_space<vmem>>, %arg11: memref<64x32xbf16, #tpu.memory_space<vmem>>, %arg12: memref<3x32x64xbf16, #tpu.memory_space<vmem>>, %arg13: memref<32x128xbf16, #tpu.memory_space<vmem>>, %arg14: memref<8x128xf32, #tpu.memory_space<vmem>>) attributes {dimension_semantics = [#tpu.dimension_semantics<parallel>], iteration_bounds = array<i64: 2>, scalar_prefetch = 0 : i64, scratch_operands = 0 : i64, tpu.core_type = #tpu.core_type<tc>, window_params = [{transform_indices = @transform_0, window_bounds = array<i64: 8, 16>}, {transform_indices = @transform_1, window_bounds = array<i64: 1, 1, 8>}, {pipeline_mode = #tpu.pipeline_mode<synchronous>, transform_indices = @transform_2, window_bounds = array<i64: 14, 128>}, {pipeline_mode = #tpu.pipeline_mode<synchronous>, transform_indices = @transform_3, window_bounds = array<i64: 16, 32>}, {pipeline_mode = #tpu.pipeline_mode<synchronous>, transform_indices = @transform_4, window_bounds = array<i64: 4, 32, 8>}, {pipeline_mode = #tpu.pipeline_mode<synchronous>, transform_indices = @transform_5, window_bounds = array<i64: 4, 32, 8>}, {pipeline_mode = #tpu.pipeline_mode<synchronous>, transform_indices = @transform_6, window_bounds = array<i64: 4, 32, 8>}, {pipeline_mode = #tpu.pipeline_mode<synchronous>, transform_indices = @transform_7, window_bounds = array<i64: 3, 4, 1, 8>}, {pipeline_mode = #tpu.pipeline_mode<synchronous>, transform_indices = @transform_8, window_bounds = array<i64: 4, 8, 32>}, {pipeline_mode = #tpu.pipeline_mode<synchronous>, transform_indices = @transform_9, window_bounds = array<i64: 32, 64>}, {pipeline_mode = #tpu.pipeline_mode<synchronous>, transform_indices = @transform_10, window_bounds = array<i64: 64, 32>}, {pipeline_mode = #tpu.pipeline_mode<synchronous>, transform_indices = @transform_11, window_bounds = array<i64: 3, 32, 64>}, {pipeline_mode = #tpu.pipeline_mode<synchronous>, transform_indices = @transform_12, window_bounds = array<i64: 32, 128>}, {transform_indices = @transform_13, window_bounds = array<i64: 8, 128>}]} {
    %c0 = arith.constant 0 : index
    %c0_0 = arith.constant 0 : index
    %c0_1 = arith.constant 0 : index
    %0 = vector.load %arg2[%c0, %c0_0, %c0_1] : memref<1x1x8xf32, #tpu.memory_space<vmem>>, vector<1x1x8xf32>
    %1 = vector.shape_cast %0 : vector<1x1x8xf32> to vector<1x8xf32>
    %c0_2 = arith.constant 0 : index
    %c0_3 = arith.constant 0 : index
    %2 = vector.load %arg1[%c0_2, %c0_3] : memref<8x16xf32, #tpu.memory_space<vmem>>, vector<8x16xf32>
    %c0_4 = arith.constant 0 : index
    %c0_5 = arith.constant 0 : index
    %3 = vector.load %arg3[%c0_4, %c0_5] : memref<14x128xf32, #tpu.memory_space<vmem>>, vector<1x16xf32>
    %c1 = arith.constant 1 : index
    %c0_6 = arith.constant 0 : index
    %4 = vector.load %arg3[%c1, %c0_6] : memref<14x128xf32, #tpu.memory_space<vmem>>, vector<1x16xf32>
    %cst = arith.constant dense<0.000000e+00> : vector<8xf32>
    %5 = vector.multi_reduction <add>, %2, %cst [1] : vector<8x16xf32> to vector<8xf32>
    %6 = vector.shape_cast %5 : vector<8xf32> to vector<8x1xf32>
    %cst_7 = arith.constant 1.600000e+01 : f32
    %7 = vector.broadcast %cst_7 : f32 to vector<8x1xf32>
    %8 = arith.divf %6, %7 : vector<8x1xf32>
    %9 = vector.broadcast %8 : vector<8x1xf32> to vector<8x16xf32>
    %10 = arith.subf %2, %9 : vector<8x16xf32>
    %11 = arith.mulf %10, %10 : vector<8x16xf32>
    %cst_8 = arith.constant dense<0.000000e+00> : vector<8xf32>
    %12 = vector.multi_reduction <add>, %11, %cst_8 [1] : vector<8x16xf32> to vector<8xf32>
    %13 = vector.shape_cast %12 : vector<8xf32> to vector<8x1xf32>
    %cst_9 = arith.constant 1.600000e+01 : f32
    %14 = vector.broadcast %cst_9 : f32 to vector<8x1xf32>
    %15 = arith.divf %13, %14 : vector<8x1xf32>
    %16 = vector.broadcast %8 : vector<8x1xf32> to vector<8x16xf32>
    %17 = arith.subf %2, %16 : vector<8x16xf32>
    %cst_10 = arith.constant 9.99999996E-13 : f32
    %18 = vector.broadcast %cst_10 : f32 to vector<8x1xf32>
    %19 = arith.addf %15, %18 : vector<8x1xf32>
    %20 = math.rsqrt %19 : vector<8x1xf32>
    %21 = vector.broadcast %20 : vector<8x1xf32> to vector<8x16xf32>
    %22 = arith.mulf %17, %21 : vector<8x16xf32>
    %23 = vector.broadcast %3 : vector<1x16xf32> to vector<8x16xf32>
    %24 = arith.mulf %22, %23 : vector<8x16xf32>
    %25 = vector.broadcast %4 : vector<1x16xf32> to vector<8x16xf32>
    %26 = arith.addf %24, %25 : vector<8x16xf32>
    %c0_11 = arith.constant 0 : index
    %c0_12 = arith.constant 0 : index
    %27 = vector.load %arg4[%c0_11, %c0_12] : memref<16x32xbf16, #tpu.memory_space<vmem>>, vector<16x32xbf16>
    %28 = arith.truncf %26 : vector<8x16xf32> to vector<8x16xbf16>
    %cst_13 = arith.constant dense<0.000000e+00> : vector<8x32xf32>
    %29 = tpu.matmul %28, %27, %cst_13 {dimension_numbers = #tpu.dot_dimension_numbers<[1], [0], [0], [1], [0, 0, 1, 1], [], []>} : vector<8x16xbf16>, vector<16x32xbf16>, vector<8x32xf32> -> vector<8x32xf32>
    %c2 = arith.constant 2 : index
    %c0_14 = arith.constant 0 : index
    %30 = vector.load %arg3[%c2, %c0_14] : memref<14x128xf32, #tpu.memory_space<vmem>>, vector<1x32xf32>
    %31 = vector.broadcast %30 : vector<1x32xf32> to vector<8x32xf32>
    %32 = arith.addf %29, %31 : vector<8x32xf32>
    %c0_i32 = arith.constant 0 : i32
    %c2_i32 = arith.constant 2 : i32
    %33 = arith.addi %c0_i32, %c2_i32 : i32
    %c1_i32 = arith.constant 1 : i32
    %34 = scf.for %arg15 = %c0_i32 to %33 step %c1_i32 iter_args(%arg16 = %32) -> (vector<8x32xf32>)  : i32 {
      %c3 = arith.constant 3 : index
      %c0_45 = arith.constant 0 : index
      %105 = vector.load %arg3[%c3, %c0_45] : memref<14x128xf32, #tpu.memory_space<vmem>>, vector<1x32xf32>
      %106 = arith.truncf %arg16 : vector<8x32xf32> to vector<8x32xbf16>
      %c0_46 = arith.constant 0 : index
      %c0_47 = arith.constant 0 : index
      %c0_48 = arith.constant 0 : index
      %107 = vector.load %arg5[%c0_46, %c0_47, %c0_48] : memref<4x32x8xbf16, #tpu.memory_space<vmem>>, vector<1x32x8xbf16>
      %108 = vector.shape_cast %107 : vector<1x32x8xbf16> to vector<32x8xbf16>
      %cst_49 = arith.constant dense<0.000000e+00> : vector<8x8xf32>
      %109 = tpu.matmul %106, %108, %cst_49 {dimension_numbers = #tpu.dot_dimension_numbers<[1], [0], [0], [1], [0, 0, 1, 1], [], []>} : vector<8x32xbf16>, vector<32x8xbf16>, vector<8x8xf32> -> vector<8x8xf32>
      %c0_50 = arith.constant 0 : index
      %c0_51 = arith.constant 0 : index
      %c0_52 = arith.constant 0 : index
      %c0_53 = arith.constant 0 : index
      %110 = vector.load %arg8[%c0_50, %c0_51, %c0_52, %c0_53] : memref<3x4x1x8xf32, #tpu.memory_space<vmem>>, vector<1x1x1x8xf32>
      %111 = vector.shape_cast %110 : vector<1x1x1x8xf32> to vector<1x8xf32>
      %112 = vector.broadcast %111 : vector<1x8xf32> to vector<8x8xf32>
      %113 = arith.addf %109, %112 : vector<8x8xf32>
      %c0_54 = arith.constant 0 : index
      %c0_55 = arith.constant 0 : index
      %c0_56 = arith.constant 0 : index
      %114 = vector.load %arg6[%c0_54, %c0_55, %c0_56] : memref<4x32x8xbf16, #tpu.memory_space<vmem>>, vector<1x32x8xbf16>
      %115 = vector.shape_cast %114 : vector<1x32x8xbf16> to vector<32x8xbf16>
      %cst_57 = arith.constant dense<0.000000e+00> : vector<8x8xf32>
      %116 = tpu.matmul %106, %115, %cst_57 {dimension_numbers = #tpu.dot_dimension_numbers<[1], [0], [0], [1], [0, 0, 1, 1], [], []>} : vector<8x32xbf16>, vector<32x8xbf16>, vector<8x8xf32> -> vector<8x8xf32>
      %c1_58 = arith.constant 1 : index
      %c0_59 = arith.constant 0 : index
      %c0_60 = arith.constant 0 : index
      %c0_61 = arith.constant 0 : index
      %117 = vector.load %arg8[%c1_58, %c0_59, %c0_60, %c0_61] : memref<3x4x1x8xf32, #tpu.memory_space<vmem>>, vector<1x1x1x8xf32>
      %118 = vector.shape_cast %117 : vector<1x1x1x8xf32> to vector<1x8xf32>
      %119 = vector.broadcast %118 : vector<1x8xf32> to vector<8x8xf32>
      %120 = arith.addf %116, %119 : vector<8x8xf32>
      %c0_62 = arith.constant 0 : index
      %c0_63 = arith.constant 0 : index
      %c0_64 = arith.constant 0 : index
      %121 = vector.load %arg7[%c0_62, %c0_63, %c0_64] : memref<4x32x8xbf16, #tpu.memory_space<vmem>>, vector<1x32x8xbf16>
      %122 = vector.shape_cast %121 : vector<1x32x8xbf16> to vector<32x8xbf16>
      %cst_65 = arith.constant dense<0.000000e+00> : vector<8x8xf32>
      %123 = tpu.matmul %106, %122, %cst_65 {dimension_numbers = #tpu.dot_dimension_numbers<[1], [0], [0], [1], [0, 0, 1, 1], [], []>} : vector<8x32xbf16>, vector<32x8xbf16>, vector<8x8xf32> -> vector<8x8xf32>
      %c2_66 = arith.constant 2 : index
      %c0_67 = arith.constant 0 : index
      %c0_68 = arith.constant 0 : index
      %c0_69 = arith.constant 0 : index
      %124 = vector.load %arg8[%c2_66, %c0_67, %c0_68, %c0_69] : memref<3x4x1x8xf32, #tpu.memory_space<vmem>>, vector<1x1x1x8xf32>
      %125 = vector.shape_cast %124 : vector<1x1x1x8xf32> to vector<1x8xf32>
      %126 = vector.broadcast %125 : vector<1x8xf32> to vector<8x8xf32>
      %127 = arith.addf %123, %126 : vector<8x8xf32>
      %128 = arith.truncf %113 : vector<8x8xf32> to vector<8x8xbf16>
      %129 = arith.truncf %120 : vector<8x8xf32> to vector<8x8xbf16>
      %cst_70 = arith.constant dense<0.000000e+00> : vector<8x8xf32>
      %130 = tpu.matmul %128, %129, %cst_70 {dimension_numbers = #tpu.dot_dimension_numbers<[1], [1], [0], [0], [0, 0, 1, 0], [], []>} : vector<8x8xbf16>, vector<8x8xbf16>, vector<8x8xf32> -> vector<8x8xf32>
      %131 = vector.broadcast %1 : vector<1x8xf32> to vector<8x8xf32>
      %132 = arith.addf %130, %131 : vector<8x8xf32>
      %cst_71 = arith.constant dense<0xFF800000> : vector<8xf32>
      %133 = vector.multi_reduction <maximumf>, %132, %cst_71 [1] : vector<8x8xf32> to vector<8xf32>
      %134 = vector.shape_cast %133 : vector<8xf32> to vector<8x1xf32>
      %135 = vector.broadcast %134 : vector<8x1xf32> to vector<8x8xf32>
      %136 = arith.subf %132, %135 : vector<8x8xf32>
      %137 = math.exp %136 : vector<8x8xf32>
      %cst_72 = arith.constant dense<0.000000e+00> : vector<8xf32>
      %138 = vector.multi_reduction <add>, %137, %cst_72 [1] : vector<8x8xf32> to vector<8xf32>
      %139 = vector.shape_cast %138 : vector<8xf32> to vector<8x1xf32>
      %140 = tpu.reciprocal %139 {approx = true} : vector<8x1xf32> -> vector<8x1xf32>
      %141 = vector.broadcast %140 : vector<8x1xf32> to vector<8x8xf32>
      %142 = arith.mulf %137, %141 : vector<8x8xf32>
      %143 = arith.truncf %142 : vector<8x8xf32> to vector<8x8xbf16>
      %144 = arith.truncf %127 : vector<8x8xf32> to vector<8x8xbf16>
      %cst_73 = arith.constant dense<0.000000e+00> : vector<8x8xf32>
      %145 = tpu.matmul %143, %144, %cst_73 {dimension_numbers = #tpu.dot_dimension_numbers<[1], [0], [0], [1], [0, 0, 1, 1], [], []>} : vector<8x8xbf16>, vector<8x8xbf16>, vector<8x8xf32> -> vector<8x8xf32>
      %146 = arith.truncf %145 : vector<8x8xf32> to vector<8x8xbf16>
      %c0_74 = arith.constant 0 : index
      %c0_75 = arith.constant 0 : index
      %c0_76 = arith.constant 0 : index
      %147 = vector.load %arg9[%c0_74, %c0_75, %c0_76] : memref<4x8x32xbf16, #tpu.memory_space<vmem>>, vector<1x8x32xbf16>
      %148 = vector.shape_cast %147 : vector<1x8x32xbf16> to vector<8x32xbf16>
      %cst_77 = arith.constant dense<0.000000e+00> : vector<8x32xf32>
      %149 = tpu.matmul %146, %148, %cst_77 {dimension_numbers = #tpu.dot_dimension_numbers<[1], [0], [0], [1], [0, 0, 1, 1], [], []>} : vector<8x8xbf16>, vector<8x32xbf16>, vector<8x32xf32> -> vector<8x32xf32>
      %150 = vector.broadcast %105 : vector<1x32xf32> to vector<8x32xf32>
      %151 = arith.addf %150, %149 : vector<8x32xf32>
      %c1_78 = arith.constant 1 : index
      %c0_79 = arith.constant 0 : index
      %c0_80 = arith.constant 0 : index
      %152 = vector.load %arg5[%c1_78, %c0_79, %c0_80] : memref<4x32x8xbf16, #tpu.memory_space<vmem>>, vector<1x32x8xbf16>
      %153 = vector.shape_cast %152 : vector<1x32x8xbf16> to vector<32x8xbf16>
      %cst_81 = arith.constant dense<0.000000e+00> : vector<8x8xf32>
      %154 = tpu.matmul %106, %153, %cst_81 {dimension_numbers = #tpu.dot_dimension_numbers<[1], [0], [0], [1], [0, 0, 1, 1], [], []>} : vector<8x32xbf16>, vector<32x8xbf16>, vector<8x8xf32> -> vector<8x8xf32>
      %c0_82 = arith.constant 0 : index
      %c1_83 = arith.constant 1 : index
      %c0_84 = arith.constant 0 : index
      %c0_85 = arith.constant 0 : index
      %155 = vector.load %arg8[%c0_82, %c1_83, %c0_84, %c0_85] : memref<3x4x1x8xf32, #tpu.memory_space<vmem>>, vector<1x1x1x8xf32>
      %156 = vector.shape_cast %155 : vector<1x1x1x8xf32> to vector<1x8xf32>
      %157 = vector.broadcast %156 : vector<1x8xf32> to vector<8x8xf32>
      %158 = arith.addf %154, %157 : vector<8x8xf32>
      %c1_86 = arith.constant 1 : index
      %c0_87 = arith.constant 0 : index
      %c0_88 = arith.constant 0 : index
      %159 = vector.load %arg6[%c1_86, %c0_87, %c0_88] : memref<4x32x8xbf16, #tpu.memory_space<vmem>>, vector<1x32x8xbf16>
      %160 = vector.shape_cast %159 : vector<1x32x8xbf16> to vector<32x8xbf16>
      %cst_89 = arith.constant dense<0.000000e+00> : vector<8x8xf32>
      %161 = tpu.matmul %106, %160, %cst_89 {dimension_numbers = #tpu.dot_dimension_numbers<[1], [0], [0], [1], [0, 0, 1, 1], [], []>} : vector<8x32xbf16>, vector<32x8xbf16>, vector<8x8xf32> -> vector<8x8xf32>
      %c1_90 = arith.constant 1 : index
      %c1_91 = arith.constant 1 : index
      %c0_92 = arith.constant 0 : index
      %c0_93 = arith.constant 0 : index
      %162 = vector.load %arg8[%c1_90, %c1_91, %c0_92, %c0_93] : memref<3x4x1x8xf32, #tpu.memory_space<vmem>>, vector<1x1x1x8xf32>
      %163 = vector.shape_cast %162 : vector<1x1x1x8xf32> to vector<1x8xf32>
      %164 = vector.broadcast %163 : vector<1x8xf32> to vector<8x8xf32>
      %165 = arith.addf %161, %164 : vector<8x8xf32>
      %c1_94 = arith.constant 1 : index
      %c0_95 = arith.constant 0 : index
      %c0_96 = arith.constant 0 : index
      %166 = vector.load %arg7[%c1_94, %c0_95, %c0_96] : memref<4x32x8xbf16, #tpu.memory_space<vmem>>, vector<1x32x8xbf16>
      %167 = vector.shape_cast %166 : vector<1x32x8xbf16> to vector<32x8xbf16>
      %cst_97 = arith.constant dense<0.000000e+00> : vector<8x8xf32>
      %168 = tpu.matmul %106, %167, %cst_97 {dimension_numbers = #tpu.dot_dimension_numbers<[1], [0], [0], [1], [0, 0, 1, 1], [], []>} : vector<8x32xbf16>, vector<32x8xbf16>, vector<8x8xf32> -> vector<8x8xf32>
      %c2_98 = arith.constant 2 : index
      %c1_99 = arith.constant 1 : index
      %c0_100 = arith.constant 0 : index
      %c0_101 = arith.constant 0 : index
      %169 = vector.load %arg8[%c2_98, %c1_99, %c0_100, %c0_101] : memref<3x4x1x8xf32, #tpu.memory_space<vmem>>, vector<1x1x1x8xf32>
      %170 = vector.shape_cast %169 : vector<1x1x1x8xf32> to vector<1x8xf32>
      %171 = vector.broadcast %170 : vector<1x8xf32> to vector<8x8xf32>
      %172 = arith.addf %168, %171 : vector<8x8xf32>
      %173 = arith.truncf %158 : vector<8x8xf32> to vector<8x8xbf16>
      %174 = arith.truncf %165 : vector<8x8xf32> to vector<8x8xbf16>
      %cst_102 = arith.constant dense<0.000000e+00> : vector<8x8xf32>
      %175 = tpu.matmul %173, %174, %cst_102 {dimension_numbers = #tpu.dot_dimension_numbers<[1], [1], [0], [0], [0, 0, 1, 0], [], []>} : vector<8x8xbf16>, vector<8x8xbf16>, vector<8x8xf32> -> vector<8x8xf32>
      %176 = vector.broadcast %1 : vector<1x8xf32> to vector<8x8xf32>
      %177 = arith.addf %175, %176 : vector<8x8xf32>
      %cst_103 = arith.constant dense<0xFF800000> : vector<8xf32>
      %178 = vector.multi_reduction <maximumf>, %177, %cst_103 [1] : vector<8x8xf32> to vector<8xf32>
      %179 = vector.shape_cast %178 : vector<8xf32> to vector<8x1xf32>
      %180 = vector.broadcast %179 : vector<8x1xf32> to vector<8x8xf32>
      %181 = arith.subf %177, %180 : vector<8x8xf32>
      %182 = math.exp %181 : vector<8x8xf32>
      %cst_104 = arith.constant dense<0.000000e+00> : vector<8xf32>
      %183 = vector.multi_reduction <add>, %182, %cst_104 [1] : vector<8x8xf32> to vector<8xf32>
      %184 = vector.shape_cast %183 : vector<8xf32> to vector<8x1xf32>
      %185 = tpu.reciprocal %184 {approx = true} : vector<8x1xf32> -> vector<8x1xf32>
      %186 = vector.broadcast %185 : vector<8x1xf32> to vector<8x8xf32>
      %187 = arith.mulf %182, %186 : vector<8x8xf32>
      %188 = arith.truncf %187 : vector<8x8xf32> to vector<8x8xbf16>
      %189 = arith.truncf %172 : vector<8x8xf32> to vector<8x8xbf16>
      %cst_105 = arith.constant dense<0.000000e+00> : vector<8x8xf32>
      %190 = tpu.matmul %188, %189, %cst_105 {dimension_numbers = #tpu.dot_dimension_numbers<[1], [0], [0], [1], [0, 0, 1, 1], [], []>} : vector<8x8xbf16>, vector<8x8xbf16>, vector<8x8xf32> -> vector<8x8xf32>
      %191 = arith.truncf %190 : vector<8x8xf32> to vector<8x8xbf16>
      %c1_106 = arith.constant 1 : index
      %c0_107 = arith.constant 0 : index
      %c0_108 = arith.constant 0 : index
      %192 = vector.load %arg9[%c1_106, %c0_107, %c0_108] : memref<4x8x32xbf16, #tpu.memory_space<vmem>>, vector<1x8x32xbf16>
      %193 = vector.shape_cast %192 : vector<1x8x32xbf16> to vector<8x32xbf16>
      %cst_109 = arith.constant dense<0.000000e+00> : vector<8x32xf32>
      %194 = tpu.matmul %191, %193, %cst_109 {dimension_numbers = #tpu.dot_dimension_numbers<[1], [0], [0], [1], [0, 0, 1, 1], [], []>} : vector<8x8xbf16>, vector<8x32xbf16>, vector<8x32xf32> -> vector<8x32xf32>
      %195 = arith.addf %151, %194 : vector<8x32xf32>
      %c2_110 = arith.constant 2 : index
      %c0_111 = arith.constant 0 : index
      %c0_112 = arith.constant 0 : index
      %196 = vector.load %arg5[%c2_110, %c0_111, %c0_112] : memref<4x32x8xbf16, #tpu.memory_space<vmem>>, vector<1x32x8xbf16>
      %197 = vector.shape_cast %196 : vector<1x32x8xbf16> to vector<32x8xbf16>
      %cst_113 = arith.constant dense<0.000000e+00> : vector<8x8xf32>
      %198 = tpu.matmul %106, %197, %cst_113 {dimension_numbers = #tpu.dot_dimension_numbers<[1], [0], [0], [1], [0, 0, 1, 1], [], []>} : vector<8x32xbf16>, vector<32x8xbf16>, vector<8x8xf32> -> vector<8x8xf32>
      %c0_114 = arith.constant 0 : index
      %c2_115 = arith.constant 2 : index
      %c0_116 = arith.constant 0 : index
      %c0_117 = arith.constant 0 : index
      %199 = vector.load %arg8[%c0_114, %c2_115, %c0_116, %c0_117] : memref<3x4x1x8xf32, #tpu.memory_space<vmem>>, vector<1x1x1x8xf32>
      %200 = vector.shape_cast %199 : vector<1x1x1x8xf32> to vector<1x8xf32>
      %201 = vector.broadcast %200 : vector<1x8xf32> to vector<8x8xf32>
      %202 = arith.addf %198, %201 : vector<8x8xf32>
      %c2_118 = arith.constant 2 : index
      %c0_119 = arith.constant 0 : index
      %c0_120 = arith.constant 0 : index
      %203 = vector.load %arg6[%c2_118, %c0_119, %c0_120] : memref<4x32x8xbf16, #tpu.memory_space<vmem>>, vector<1x32x8xbf16>
      %204 = vector.shape_cast %203 : vector<1x32x8xbf16> to vector<32x8xbf16>
      %cst_121 = arith.constant dense<0.000000e+00> : vector<8x8xf32>
      %205 = tpu.matmul %106, %204, %cst_121 {dimension_numbers = #tpu.dot_dimension_numbers<[1], [0], [0], [1], [0, 0, 1, 1], [], []>} : vector<8x32xbf16>, vector<32x8xbf16>, vector<8x8xf32> -> vector<8x8xf32>
      %c1_122 = arith.constant 1 : index
      %c2_123 = arith.constant 2 : index
      %c0_124 = arith.constant 0 : index
      %c0_125 = arith.constant 0 : index
      %206 = vector.load %arg8[%c1_122, %c2_123, %c0_124, %c0_125] : memref<3x4x1x8xf32, #tpu.memory_space<vmem>>, vector<1x1x1x8xf32>
      %207 = vector.shape_cast %206 : vector<1x1x1x8xf32> to vector<1x8xf32>
      %208 = vector.broadcast %207 : vector<1x8xf32> to vector<8x8xf32>
      %209 = arith.addf %205, %208 : vector<8x8xf32>
      %c2_126 = arith.constant 2 : index
      %c0_127 = arith.constant 0 : index
      %c0_128 = arith.constant 0 : index
      %210 = vector.load %arg7[%c2_126, %c0_127, %c0_128] : memref<4x32x8xbf16, #tpu.memory_space<vmem>>, vector<1x32x8xbf16>
      %211 = vector.shape_cast %210 : vector<1x32x8xbf16> to vector<32x8xbf16>
      %cst_129 = arith.constant dense<0.000000e+00> : vector<8x8xf32>
      %212 = tpu.matmul %106, %211, %cst_129 {dimension_numbers = #tpu.dot_dimension_numbers<[1], [0], [0], [1], [0, 0, 1, 1], [], []>} : vector<8x32xbf16>, vector<32x8xbf16>, vector<8x8xf32> -> vector<8x8xf32>
      %c2_130 = arith.constant 2 : index
      %c2_131 = arith.constant 2 : index
      %c0_132 = arith.constant 0 : index
      %c0_133 = arith.constant 0 : index
      %213 = vector.load %arg8[%c2_130, %c2_131, %c0_132, %c0_133] : memref<3x4x1x8xf32, #tpu.memory_space<vmem>>, vector<1x1x1x8xf32>
      %214 = vector.shape_cast %213 : vector<1x1x1x8xf32> to vector<1x8xf32>
      %215 = vector.broadcast %214 : vector<1x8xf32> to vector<8x8xf32>
      %216 = arith.addf %212, %215 : vector<8x8xf32>
      %217 = arith.truncf %202 : vector<8x8xf32> to vector<8x8xbf16>
      %218 = arith.truncf %209 : vector<8x8xf32> to vector<8x8xbf16>
      %cst_134 = arith.constant dense<0.000000e+00> : vector<8x8xf32>
      %219 = tpu.matmul %217, %218, %cst_134 {dimension_numbers = #tpu.dot_dimension_numbers<[1], [1], [0], [0], [0, 0, 1, 0], [], []>} : vector<8x8xbf16>, vector<8x8xbf16>, vector<8x8xf32> -> vector<8x8xf32>
      %220 = vector.broadcast %1 : vector<1x8xf32> to vector<8x8xf32>
      %221 = arith.addf %219, %220 : vector<8x8xf32>
      %cst_135 = arith.constant dense<0xFF800000> : vector<8xf32>
      %222 = vector.multi_reduction <maximumf>, %221, %cst_135 [1] : vector<8x8xf32> to vector<8xf32>
      %223 = vector.shape_cast %222 : vector<8xf32> to vector<8x1xf32>
      %224 = vector.broadcast %223 : vector<8x1xf32> to vector<8x8xf32>
      %225 = arith.subf %221, %224 : vector<8x8xf32>
      %226 = math.exp %225 : vector<8x8xf32>
      %cst_136 = arith.constant dense<0.000000e+00> : vector<8xf32>
      %227 = vector.multi_reduction <add>, %226, %cst_136 [1] : vector<8x8xf32> to vector<8xf32>
      %228 = vector.shape_cast %227 : vector<8xf32> to vector<8x1xf32>
      %229 = tpu.reciprocal %228 {approx = true} : vector<8x1xf32> -> vector<8x1xf32>
      %230 = vector.broadcast %229 : vector<8x1xf32> to vector<8x8xf32>
      %231 = arith.mulf %226, %230 : vector<8x8xf32>
      %232 = arith.truncf %231 : vector<8x8xf32> to vector<8x8xbf16>
      %233 = arith.truncf %216 : vector<8x8xf32> to vector<8x8xbf16>
      %cst_137 = arith.constant dense<0.000000e+00> : vector<8x8xf32>
      %234 = tpu.matmul %232, %233, %cst_137 {dimension_numbers = #tpu.dot_dimension_numbers<[1], [0], [0], [1], [0, 0, 1, 1], [], []>} : vector<8x8xbf16>, vector<8x8xbf16>, vector<8x8xf32> -> vector<8x8xf32>
      %235 = arith.truncf %234 : vector<8x8xf32> to vector<8x8xbf16>
      %c2_138 = arith.constant 2 : index
      %c0_139 = arith.constant 0 : index
      %c0_140 = arith.constant 0 : index
      %236 = vector.load %arg9[%c2_138, %c0_139, %c0_140] : memref<4x8x32xbf16, #tpu.memory_space<vmem>>, vector<1x8x32xbf16>
      %237 = vector.shape_cast %236 : vector<1x8x32xbf16> to vector<8x32xbf16>
      %cst_141 = arith.constant dense<0.000000e+00> : vector<8x32xf32>
      %238 = tpu.matmul %235, %237, %cst_141 {dimension_numbers = #tpu.dot_dimension_numbers<[1], [0], [0], [1], [0, 0, 1, 1], [], []>} : vector<8x8xbf16>, vector<8x32xbf16>, vector<8x32xf32> -> vector<8x32xf32>
      %239 = arith.addf %195, %238 : vector<8x32xf32>
      %c3_142 = arith.constant 3 : index
      %c0_143 = arith.constant 0 : index
      %c0_144 = arith.constant 0 : index
      %240 = vector.load %arg5[%c3_142, %c0_143, %c0_144] : memref<4x32x8xbf16, #tpu.memory_space<vmem>>, vector<1x32x8xbf16>
      %241 = vector.shape_cast %240 : vector<1x32x8xbf16> to vector<32x8xbf16>
      %cst_145 = arith.constant dense<0.000000e+00> : vector<8x8xf32>
      %242 = tpu.matmul %106, %241, %cst_145 {dimension_numbers = #tpu.dot_dimension_numbers<[1], [0], [0], [1], [0, 0, 1, 1], [], []>} : vector<8x32xbf16>, vector<32x8xbf16>, vector<8x8xf32> -> vector<8x8xf32>
      %c0_146 = arith.constant 0 : index
      %c3_147 = arith.constant 3 : index
      %c0_148 = arith.constant 0 : index
      %c0_149 = arith.constant 0 : index
      %243 = vector.load %arg8[%c0_146, %c3_147, %c0_148, %c0_149] : memref<3x4x1x8xf32, #tpu.memory_space<vmem>>, vector<1x1x1x8xf32>
      %244 = vector.shape_cast %243 : vector<1x1x1x8xf32> to vector<1x8xf32>
      %245 = vector.broadcast %244 : vector<1x8xf32> to vector<8x8xf32>
      %246 = arith.addf %242, %245 : vector<8x8xf32>
      %c3_150 = arith.constant 3 : index
      %c0_151 = arith.constant 0 : index
      %c0_152 = arith.constant 0 : index
      %247 = vector.load %arg6[%c3_150, %c0_151, %c0_152] : memref<4x32x8xbf16, #tpu.memory_space<vmem>>, vector<1x32x8xbf16>
      %248 = vector.shape_cast %247 : vector<1x32x8xbf16> to vector<32x8xbf16>
      %cst_153 = arith.constant dense<0.000000e+00> : vector<8x8xf32>
      %249 = tpu.matmul %106, %248, %cst_153 {dimension_numbers = #tpu.dot_dimension_numbers<[1], [0], [0], [1], [0, 0, 1, 1], [], []>} : vector<8x32xbf16>, vector<32x8xbf16>, vector<8x8xf32> -> vector<8x8xf32>
      %c1_154 = arith.constant 1 : index
      %c3_155 = arith.constant 3 : index
      %c0_156 = arith.constant 0 : index
      %c0_157 = arith.constant 0 : index
      %250 = vector.load %arg8[%c1_154, %c3_155, %c0_156, %c0_157] : memref<3x4x1x8xf32, #tpu.memory_space<vmem>>, vector<1x1x1x8xf32>
      %251 = vector.shape_cast %250 : vector<1x1x1x8xf32> to vector<1x8xf32>
      %252 = vector.broadcast %251 : vector<1x8xf32> to vector<8x8xf32>
      %253 = arith.addf %249, %252 : vector<8x8xf32>
      %c3_158 = arith.constant 3 : index
      %c0_159 = arith.constant 0 : index
      %c0_160 = arith.constant 0 : index
      %254 = vector.load %arg7[%c3_158, %c0_159, %c0_160] : memref<4x32x8xbf16, #tpu.memory_space<vmem>>, vector<1x32x8xbf16>
      %255 = vector.shape_cast %254 : vector<1x32x8xbf16> to vector<32x8xbf16>
      %cst_161 = arith.constant dense<0.000000e+00> : vector<8x8xf32>
      %256 = tpu.matmul %106, %255, %cst_161 {dimension_numbers = #tpu.dot_dimension_numbers<[1], [0], [0], [1], [0, 0, 1, 1], [], []>} : vector<8x32xbf16>, vector<32x8xbf16>, vector<8x8xf32> -> vector<8x8xf32>
      %c2_162 = arith.constant 2 : index
      %c3_163 = arith.constant 3 : index
      %c0_164 = arith.constant 0 : index
      %c0_165 = arith.constant 0 : index
      %257 = vector.load %arg8[%c2_162, %c3_163, %c0_164, %c0_165] : memref<3x4x1x8xf32, #tpu.memory_space<vmem>>, vector<1x1x1x8xf32>
      %258 = vector.shape_cast %257 : vector<1x1x1x8xf32> to vector<1x8xf32>
      %259 = vector.broadcast %258 : vector<1x8xf32> to vector<8x8xf32>
      %260 = arith.addf %256, %259 : vector<8x8xf32>
      %261 = arith.truncf %246 : vector<8x8xf32> to vector<8x8xbf16>
      %262 = arith.truncf %253 : vector<8x8xf32> to vector<8x8xbf16>
      %cst_166 = arith.constant dense<0.000000e+00> : vector<8x8xf32>
      %263 = tpu.matmul %261, %262, %cst_166 {dimension_numbers = #tpu.dot_dimension_numbers<[1], [1], [0], [0], [0, 0, 1, 0], [], []>} : vector<8x8xbf16>, vector<8x8xbf16>, vector<8x8xf32> -> vector<8x8xf32>
      %264 = vector.broadcast %1 : vector<1x8xf32> to vector<8x8xf32>
      %265 = arith.addf %263, %264 : vector<8x8xf32>
      %cst_167 = arith.constant dense<0xFF800000> : vector<8xf32>
      %266 = vector.multi_reduction <maximumf>, %265, %cst_167 [1] : vector<8x8xf32> to vector<8xf32>
      %267 = vector.shape_cast %266 : vector<8xf32> to vector<8x1xf32>
      %268 = vector.broadcast %267 : vector<8x1xf32> to vector<8x8xf32>
      %269 = arith.subf %265, %268 : vector<8x8xf32>
      %270 = math.exp %269 : vector<8x8xf32>
      %cst_168 = arith.constant dense<0.000000e+00> : vector<8xf32>
      %271 = vector.multi_reduction <add>, %270, %cst_168 [1] : vector<8x8xf32> to vector<8xf32>
      %272 = vector.shape_cast %271 : vector<8xf32> to vector<8x1xf32>
      %273 = tpu.reciprocal %272 {approx = true} : vector<8x1xf32> -> vector<8x1xf32>
      %274 = vector.broadcast %273 : vector<8x1xf32> to vector<8x8xf32>
      %275 = arith.mulf %270, %274 : vector<8x8xf32>
      %276 = arith.truncf %275 : vector<8x8xf32> to vector<8x8xbf16>
      %277 = arith.truncf %260 : vector<8x8xf32> to vector<8x8xbf16>
      %cst_169 = arith.constant dense<0.000000e+00> : vector<8x8xf32>
      %278 = tpu.matmul %276, %277, %cst_169 {dimension_numbers = #tpu.dot_dimension_numbers<[1], [0], [0], [1], [0, 0, 1, 1], [], []>} : vector<8x8xbf16>, vector<8x8xbf16>, vector<8x8xf32> -> vector<8x8xf32>
      %279 = arith.truncf %278 : vector<8x8xf32> to vector<8x8xbf16>
      %c3_170 = arith.constant 3 : index
      %c0_171 = arith.constant 0 : index
      %c0_172 = arith.constant 0 : index
      %280 = vector.load %arg9[%c3_170, %c0_171, %c0_172] : memref<4x8x32xbf16, #tpu.memory_space<vmem>>, vector<1x8x32xbf16>
      %281 = vector.shape_cast %280 : vector<1x8x32xbf16> to vector<8x32xbf16>
      %cst_173 = arith.constant dense<0.000000e+00> : vector<8x32xf32>
      %282 = tpu.matmul %279, %281, %cst_173 {dimension_numbers = #tpu.dot_dimension_numbers<[1], [0], [0], [1], [0, 0, 1, 1], [], []>} : vector<8x8xbf16>, vector<8x32xbf16>, vector<8x32xf32> -> vector<8x32xf32>
      %283 = arith.addf %239, %282 : vector<8x32xf32>
      %284 = arith.addf %arg16, %283 : vector<8x32xf32>
      %c4 = arith.constant 4 : index
      %c0_174 = arith.constant 0 : index
      %285 = vector.load %arg3[%c4, %c0_174] : memref<14x128xf32, #tpu.memory_space<vmem>>, vector<1x32xf32>
      %c5 = arith.constant 5 : index
      %c0_175 = arith.constant 0 : index
      %286 = vector.load %arg3[%c5, %c0_175] : memref<14x128xf32, #tpu.memory_space<vmem>>, vector<1x32xf32>
      %cst_176 = arith.constant dense<0.000000e+00> : vector<8xf32>
      %287 = vector.multi_reduction <add>, %284, %cst_176 [1] : vector<8x32xf32> to vector<8xf32>
      %288 = vector.shape_cast %287 : vector<8xf32> to vector<8x1xf32>
      %cst_177 = arith.constant 3.200000e+01 : f32
      %289 = vector.broadcast %cst_177 : f32 to vector<8x1xf32>
      %290 = arith.divf %288, %289 : vector<8x1xf32>
      %291 = vector.broadcast %290 : vector<8x1xf32> to vector<8x32xf32>
      %292 = arith.subf %284, %291 : vector<8x32xf32>
      %293 = arith.mulf %292, %292 : vector<8x32xf32>
      %cst_178 = arith.constant dense<0.000000e+00> : vector<8xf32>
      %294 = vector.multi_reduction <add>, %293, %cst_178 [1] : vector<8x32xf32> to vector<8xf32>
      %295 = vector.shape_cast %294 : vector<8xf32> to vector<8x1xf32>
      %cst_179 = arith.constant 3.200000e+01 : f32
      %296 = vector.broadcast %cst_179 : f32 to vector<8x1xf32>
      %297 = arith.divf %295, %296 : vector<8x1xf32>
      %298 = vector.broadcast %290 : vector<8x1xf32> to vector<8x32xf32>
      %299 = arith.subf %284, %298 : vector<8x32xf32>
      %cst_180 = arith.constant 9.99999996E-13 : f32
      %300 = vector.broadcast %cst_180 : f32 to vector<8x1xf32>
      %301 = arith.addf %297, %300 : vector<8x1xf32>
      %302 = math.rsqrt %301 : vector<8x1xf32>
      %303 = vector.broadcast %302 : vector<8x1xf32> to vector<8x32xf32>
      %304 = arith.mulf %299, %303 : vector<8x32xf32>
      %305 = vector.broadcast %285 : vector<1x32xf32> to vector<8x32xf32>
      %306 = arith.mulf %304, %305 : vector<8x32xf32>
      %307 = vector.broadcast %286 : vector<1x32xf32> to vector<8x32xf32>
      %308 = arith.addf %306, %307 : vector<8x32xf32>
      %c0_181 = arith.constant 0 : index
      %c0_182 = arith.constant 0 : index
      %309 = vector.load %arg10[%c0_181, %c0_182] : memref<32x64xbf16, #tpu.memory_space<vmem>>, vector<32x64xbf16>
      %310 = arith.truncf %308 : vector<8x32xf32> to vector<8x32xbf16>
      %cst_183 = arith.constant dense<0.000000e+00> : vector<8x64xf32>
      %311 = tpu.matmul %310, %309, %cst_183 {dimension_numbers = #tpu.dot_dimension_numbers<[1], [0], [0], [1], [0, 0, 1, 1], [], []>} : vector<8x32xbf16>, vector<32x64xbf16>, vector<8x64xf32> -> vector<8x64xf32>
      %c6 = arith.constant 6 : index
      %c0_184 = arith.constant 0 : index
      %312 = vector.load %arg3[%c6, %c0_184] : memref<14x128xf32, #tpu.memory_space<vmem>>, vector<1x64xf32>
      %313 = vector.broadcast %312 : vector<1x64xf32> to vector<8x64xf32>
      %314 = arith.addf %311, %313 : vector<8x64xf32>
      %315 = arith.mulf %314, %314 : vector<8x64xf32>
      %316 = arith.mulf %314, %315 : vector<8x64xf32>
      %cst_185 = arith.constant 4.471500e-02 : f32
      %317 = vector.broadcast %cst_185 : f32 to vector<8x64xf32>
      %318 = arith.mulf %317, %316 : vector<8x64xf32>
      %319 = arith.addf %314, %318 : vector<8x64xf32>
      %cst_186 = arith.constant 0.797884583 : f32
      %320 = vector.broadcast %cst_186 : f32 to vector<8x64xf32>
      %321 = arith.mulf %320, %319 : vector<8x64xf32>
      %322 = math.tanh %321 : vector<8x64xf32>
      %cst_187 = arith.constant 1.000000e+00 : f32
      %323 = vector.broadcast %cst_187 : f32 to vector<8x64xf32>
      %324 = arith.addf %323, %322 : vector<8x64xf32>
      %cst_188 = arith.constant 5.000000e-01 : f32
      %325 = vector.broadcast %cst_188 : f32 to vector<8x64xf32>
      %326 = arith.mulf %325, %324 : vector<8x64xf32>
      %327 = arith.mulf %314, %326 : vector<8x64xf32>
      %c0_189 = arith.constant 0 : index
      %c0_190 = arith.constant 0 : index
      %328 = vector.load %arg11[%c0_189, %c0_190] : memref<64x32xbf16, #tpu.memory_space<vmem>>, vector<64x32xbf16>
      %329 = arith.truncf %327 : vector<8x64xf32> to vector<8x64xbf16>
      %cst_191 = arith.constant dense<0.000000e+00> : vector<8x32xf32>
      %330 = tpu.matmul %329, %328, %cst_191 {dimension_numbers = #tpu.dot_dimension_numbers<[1], [0], [0], [1], [0, 0, 1, 1], [], []>} : vector<8x64xbf16>, vector<64x32xbf16>, vector<8x32xf32> -> vector<8x32xf32>
      %331 = arith.addf %308, %330 : vector<8x32xf32>
      %c7 = arith.constant 7 : index
      %c0_192 = arith.constant 0 : index
      %332 = vector.load %arg3[%c7, %c0_192] : memref<14x128xf32, #tpu.memory_space<vmem>>, vector<1x32xf32>
      %333 = vector.broadcast %332 : vector<1x32xf32> to vector<8x32xf32>
      %334 = arith.addf %331, %333 : vector<8x32xf32>
      %c8 = arith.constant 8 : index
      %c0_193 = arith.constant 0 : index
      %335 = vector.load %arg3[%c8, %c0_193] : memref<14x128xf32, #tpu.memory_space<vmem>>, vector<1x32xf32>
      %c9 = arith.constant 9 : index
      %c0_194 = arith.constant 0 : index
      %336 = vector.load %arg3[%c9, %c0_194] : memref<14x128xf32, #tpu.memory_space<vmem>>, vector<1x32xf32>
      %cst_195 = arith.constant dense<0.000000e+00> : vector<8xf32>
      %337 = vector.multi_reduction <add>, %334, %cst_195 [1] : vector<8x32xf32> to vector<8xf32>
      %338 = vector.shape_cast %337 : vector<8xf32> to vector<8x1xf32>
      %cst_196 = arith.constant 3.200000e+01 : f32
      %339 = vector.broadcast %cst_196 : f32 to vector<8x1xf32>
      %340 = arith.divf %338, %339 : vector<8x1xf32>
      %341 = vector.broadcast %340 : vector<8x1xf32> to vector<8x32xf32>
      %342 = arith.subf %334, %341 : vector<8x32xf32>
      %343 = arith.mulf %342, %342 : vector<8x32xf32>
      %cst_197 = arith.constant dense<0.000000e+00> : vector<8xf32>
      %344 = vector.multi_reduction <add>, %343, %cst_197 [1] : vector<8x32xf32> to vector<8xf32>
      %345 = vector.shape_cast %344 : vector<8xf32> to vector<8x1xf32>
      %cst_198 = arith.constant 3.200000e+01 : f32
      %346 = vector.broadcast %cst_198 : f32 to vector<8x1xf32>
      %347 = arith.divf %345, %346 : vector<8x1xf32>
      %348 = vector.broadcast %340 : vector<8x1xf32> to vector<8x32xf32>
      %349 = arith.subf %334, %348 : vector<8x32xf32>
      %cst_199 = arith.constant 9.99999996E-13 : f32
      %350 = vector.broadcast %cst_199 : f32 to vector<8x1xf32>
      %351 = arith.addf %347, %350 : vector<8x1xf32>
      %352 = math.rsqrt %351 : vector<8x1xf32>
      %353 = vector.broadcast %352 : vector<8x1xf32> to vector<8x32xf32>
      %354 = arith.mulf %349, %353 : vector<8x32xf32>
      %355 = vector.broadcast %335 : vector<1x32xf32> to vector<8x32xf32>
      %356 = arith.mulf %354, %355 : vector<8x32xf32>
      %357 = vector.broadcast %336 : vector<1x32xf32> to vector<8x32xf32>
      %358 = arith.addf %356, %357 : vector<8x32xf32>
      scf.yield %358 : vector<8x32xf32>
    }
    %c0_15 = arith.constant 0 : index
    %c0_16 = arith.constant 0 : index
    %c0_17 = arith.constant 0 : index
    %35 = vector.load %arg12[%c0_15, %c0_16, %c0_17] : memref<3x32x64xbf16, #tpu.memory_space<vmem>>, vector<1x32x64xbf16>
    %36 = vector.shape_cast %35 : vector<1x32x64xbf16> to vector<32x64xbf16>
    %37 = arith.truncf %34 : vector<8x32xf32> to vector<8x32xbf16>
    %cst_18 = arith.constant dense<0.000000e+00> : vector<8x64xf32>
    %38 = tpu.matmul %37, %36, %cst_18 {dimension_numbers = #tpu.dot_dimension_numbers<[1], [0], [0], [1], [0, 0, 1, 1], [], []>} : vector<8x32xbf16>, vector<32x64xbf16>, vector<8x64xf32> -> vector<8x64xf32>
    %c11 = arith.constant 11 : index
    %c0_19 = arith.constant 0 : index
    %39 = vector.load %arg3[%c11, %c0_19] : memref<14x128xf32, #tpu.memory_space<vmem>>, vector<1x64xf32>
    %40 = vector.broadcast %39 : vector<1x64xf32> to vector<8x64xf32>
    %41 = arith.addf %38, %40 : vector<8x64xf32>
    %42 = vector.extract_strided_slice %41 {offsets = [0, 0], sizes = [8, 32], strides = [1, 1]} : vector<8x64xf32> to vector<8x32xf32>
    %cst_20 = arith.constant 0.000000e+00 : f32
    %43 = vector.broadcast %cst_20 : f32 to vector<8x32xf32>
    %44 = arith.maximumf %42, %43 : vector<8x32xf32>
    %45 = vector.extract_strided_slice %41 {offsets = [0, 32], sizes = [8, 32], strides = [1, 1]} : vector<8x64xf32> to vector<8x32xf32>
    %46 = arith.negf %45 : vector<8x32xf32>
    %47 = math.exp %46 : vector<8x32xf32>
    %cst_21 = arith.constant 1.000000e+00 : f32
    %48 = vector.broadcast %cst_21 : f32 to vector<8x32xf32>
    %49 = arith.addf %48, %47 : vector<8x32xf32>
    %50 = arith.divf %48, %49 : vector<8x32xf32>
    %51 = arith.mulf %50, %44 : vector<8x32xf32>
    %cst_22 = arith.constant 1.000000e+00 : f32
    %52 = vector.broadcast %cst_22 : f32 to vector<8x32xf32>
    %53 = arith.subf %52, %50 : vector<8x32xf32>
    %54 = arith.mulf %53, %34 : vector<8x32xf32>
    %55 = arith.addf %51, %54 : vector<8x32xf32>
    %c1_23 = arith.constant 1 : index
    %c0_24 = arith.constant 0 : index
    %c0_25 = arith.constant 0 : index
    %56 = vector.load %arg12[%c1_23, %c0_24, %c0_25] : memref<3x32x64xbf16, #tpu.memory_space<vmem>>, vector<1x32x64xbf16>
    %57 = vector.shape_cast %56 : vector<1x32x64xbf16> to vector<32x64xbf16>
    %58 = arith.truncf %55 : vector<8x32xf32> to vector<8x32xbf16>
    %cst_26 = arith.constant dense<0.000000e+00> : vector<8x64xf32>
    %59 = tpu.matmul %58, %57, %cst_26 {dimension_numbers = #tpu.dot_dimension_numbers<[1], [0], [0], [1], [0, 0, 1, 1], [], []>} : vector<8x32xbf16>, vector<32x64xbf16>, vector<8x64xf32> -> vector<8x64xf32>
    %c12 = arith.constant 12 : index
    %c0_27 = arith.constant 0 : index
    %60 = vector.load %arg3[%c12, %c0_27] : memref<14x128xf32, #tpu.memory_space<vmem>>, vector<1x64xf32>
    %61 = vector.broadcast %60 : vector<1x64xf32> to vector<8x64xf32>
    %62 = arith.addf %59, %61 : vector<8x64xf32>
    %63 = vector.extract_strided_slice %62 {offsets = [0, 0], sizes = [8, 32], strides = [1, 1]} : vector<8x64xf32> to vector<8x32xf32>
    %cst_28 = arith.constant 0.000000e+00 : f32
    %64 = vector.broadcast %cst_28 : f32 to vector<8x32xf32>
    %65 = arith.maximumf %63, %64 : vector<8x32xf32>
    %66 = vector.extract_strided_slice %62 {offsets = [0, 32], sizes = [8, 32], strides = [1, 1]} : vector<8x64xf32> to vector<8x32xf32>
    %67 = arith.negf %66 : vector<8x32xf32>
    %68 = math.exp %67 : vector<8x32xf32>
    %cst_29 = arith.constant 1.000000e+00 : f32
    %69 = vector.broadcast %cst_29 : f32 to vector<8x32xf32>
    %70 = arith.addf %69, %68 : vector<8x32xf32>
    %71 = arith.divf %69, %70 : vector<8x32xf32>
    %72 = arith.mulf %71, %65 : vector<8x32xf32>
    %cst_30 = arith.constant 1.000000e+00 : f32
    %73 = vector.broadcast %cst_30 : f32 to vector<8x32xf32>
    %74 = arith.subf %73, %71 : vector<8x32xf32>
    %75 = arith.mulf %74, %55 : vector<8x32xf32>
    %76 = arith.addf %72, %75 : vector<8x32xf32>
    %c2_31 = arith.constant 2 : index
    %c0_32 = arith.constant 0 : index
    %c0_33 = arith.constant 0 : index
    %77 = vector.load %arg12[%c2_31, %c0_32, %c0_33] : memref<3x32x64xbf16, #tpu.memory_space<vmem>>, vector<1x32x64xbf16>
    %78 = vector.shape_cast %77 : vector<1x32x64xbf16> to vector<32x64xbf16>
    %79 = arith.truncf %76 : vector<8x32xf32> to vector<8x32xbf16>
    %cst_34 = arith.constant dense<0.000000e+00> : vector<8x64xf32>
    %80 = tpu.matmul %79, %78, %cst_34 {dimension_numbers = #tpu.dot_dimension_numbers<[1], [0], [0], [1], [0, 0, 1, 1], [], []>} : vector<8x32xbf16>, vector<32x64xbf16>, vector<8x64xf32> -> vector<8x64xf32>
    %c13 = arith.constant 13 : index
    %c0_35 = arith.constant 0 : index
    %81 = vector.load %arg3[%c13, %c0_35] : memref<14x128xf32, #tpu.memory_space<vmem>>, vector<1x64xf32>
    %82 = vector.broadcast %81 : vector<1x64xf32> to vector<8x64xf32>
    %83 = arith.addf %80, %82 : vector<8x64xf32>
    %84 = vector.extract_strided_slice %83 {offsets = [0, 0], sizes = [8, 32], strides = [1, 1]} : vector<8x64xf32> to vector<8x32xf32>
    %cst_36 = arith.constant 0.000000e+00 : f32
    %85 = vector.broadcast %cst_36 : f32 to vector<8x32xf32>
    %86 = arith.maximumf %84, %85 : vector<8x32xf32>
    %87 = vector.extract_strided_slice %83 {offsets = [0, 32], sizes = [8, 32], strides = [1, 1]} : vector<8x64xf32> to vector<8x32xf32>
    %88 = arith.negf %87 : vector<8x32xf32>
    %89 = math.exp %88 : vector<8x32xf32>
    %cst_37 = arith.constant 1.000000e+00 : f32
    %90 = vector.broadcast %cst_37 : f32 to vector<8x32xf32>
    %91 = arith.addf %90, %89 : vector<8x32xf32>
    %92 = arith.divf %90, %91 : vector<8x32xf32>
    %93 = arith.mulf %92, %86 : vector<8x32xf32>
    %cst_38 = arith.constant 1.000000e+00 : f32
    %94 = vector.broadcast %cst_38 : f32 to vector<8x32xf32>
    %95 = arith.subf %94, %92 : vector<8x32xf32>
    %96 = arith.mulf %95, %76 : vector<8x32xf32>
    %97 = arith.addf %93, %96 : vector<8x32xf32>
    %c0_39 = arith.constant 0 : index
    %c0_40 = arith.constant 0 : index
    %98 = vector.load %arg13[%c0_39, %c0_40] : memref<32x128xbf16, #tpu.memory_space<vmem>>, vector<32x128xbf16>
    %99 = arith.truncf %97 : vector<8x32xf32> to vector<8x32xbf16>
    %cst_41 = arith.constant dense<0.000000e+00> : vector<8x128xf32>
    %100 = tpu.matmul %99, %98, %cst_41 {dimension_numbers = #tpu.dot_dimension_numbers<[1], [0], [0], [1], [0, 0, 1, 1], [], []>} : vector<8x32xbf16>, vector<32x128xbf16>, vector<8x128xf32> -> vector<8x128xf32>
    %c10 = arith.constant 10 : index
    %c0_42 = arith.constant 0 : index
    %101 = vector.load %arg3[%c10, %c0_42] : memref<14x128xf32, #tpu.memory_space<vmem>>, vector<1x128xf32>
    %102 = vector.broadcast %101 : vector<1x128xf32> to vector<8x128xf32>
    %103 = arith.addf %100, %102 : vector<8x128xf32>
    %c0_43 = arith.constant 0 : index
    %c0_44 = arith.constant 0 : index
    %104 = vector.load %arg14[%c0_43, %c0_44] : memref<8x128xf32, #tpu.memory_space<vmem>>, vector<8x128xf32>
    tpu.vector_store %arg14[%c0_43, %c0_44], %103 {strides = array<i32>} : memref<8x128xf32, #tpu.memory_space<vmem>>, vector<8x128xf32>,
    return
  }
  func.func @transform_0(%arg0: i32) -> (i32, i32) {
    %c0_i32 = arith.constant 0 : i32
    %c0_i32_0 = arith.constant 0 : i32
    return %arg0, %c0_i32 : i32, i32
  }
  func.func @transform_1(%arg0: i32) -> (i32, i32, i32) {
    %c0_i32 = arith.constant 0 : i32
    %c0_i32_0 = arith.constant 0 : i32
    %c0_i32_1 = arith.constant 0 : i32
    return %arg0, %c0_i32, %c0_i32_0 : i32, i32, i32
  }
  func.func @transform_2(%arg0: i32) -> (i32, i32) {
    %c0_i32 = arith.constant 0 : i32
    %c0_i32_0 = arith.constant 0 : i32
    %c0_i32_1 = arith.constant 0 : i32
    return %c0_i32, %c0_i32_0 : i32, i32
  }
  func.func @transform_3(%arg0: i32) -> (i32, i32) {
    %c0_i32 = arith.constant 0 : i32
    %c0_i32_0 = arith.constant 0 : i32
    %c0_i32_1 = arith.constant 0 : i32
    return %c0_i32, %c0_i32_0 : i32, i32
  }
  func.func @transform_4(%arg0: i32) -> (i32, i32, i32) {
    %c0_i32 = arith.constant 0 : i32
    %c0_i32_0 = arith.constant 0 : i32
    %c0_i32_1 = arith.constant 0 : i32
    %c0_i32_2 = arith.constant 0 : i32
    return %c0_i32, %c0_i32_0, %c0_i32_1 : i32, i32, i32
  }
  func.func @transform_5(%arg0: i32) -> (i32, i32, i32) {
    %c0_i32 = arith.constant 0 : i32
    %c0_i32_0 = arith.constant 0 : i32
    %c0_i32_1 = arith.constant 0 : i32
    %c0_i32_2 = arith.constant 0 : i32
    return %c0_i32, %c0_i32_0, %c0_i32_1 : i32, i32, i32
  }
  func.func @transform_6(%arg0: i32) -> (i32, i32, i32) {
    %c0_i32 = arith.constant 0 : i32
    %c0_i32_0 = arith.constant 0 : i32
    %c0_i32_1 = arith.constant 0 : i32
    %c0_i32_2 = arith.constant 0 : i32
    return %c0_i32, %c0_i32_0, %c0_i32_1 : i32, i32, i32
  }
  func.func @transform_7(%arg0: i32) -> (i32, i32, i32, i32) {
    %c0_i32 = arith.constant 0 : i32
    %c0_i32_0 = arith.constant 0 : i32
    %c0_i32_1 = arith.constant 0 : i32
    %c0_i32_2 = arith.constant 0 : i32
    %c0_i32_3 = arith.constant 0 : i32
    return %c0_i32, %c0_i32_0, %c0_i32_1, %c0_i32_2 : i32, i32, i32, i32
  }
  func.func @transform_8(%arg0: i32) -> (i32, i32, i32) {
    %c0_i32 = arith.constant 0 : i32
    %c0_i32_0 = arith.constant 0 : i32
    %c0_i32_1 = arith.constant 0 : i32
    %c0_i32_2 = arith.constant 0 : i32
    return %c0_i32, %c0_i32_0, %c0_i32_1 : i32, i32, i32
  }
  func.func @transform_9(%arg0: i32) -> (i32, i32) {
    %c0_i32 = arith.constant 0 : i32
    %c0_i32_0 = arith.constant 0 : i32
    %c0_i32_1 = arith.constant 0 : i32
    return %c0_i32, %c0_i32_0 : i32, i32
  }
  func.func @transform_10(%arg0: i32) -> (i32, i32) {
    %c0_i32 = arith.constant 0 : i32
    %c0_i32_0 = arith.constant 0 : i32
    %c0_i32_1 = arith.constant 0 : i32
    return %c0_i32, %c0_i32_0 : i32, i32
  }
  func.func @transform_11(%arg0: i32) -> (i32, i32, i32) {
    %c0_i32 = arith.constant 0 : i32
    %c0_i32_0 = arith.constant 0 : i32
    %c0_i32_1 = arith.constant 0 : i32
    %c0_i32_2 = arith.constant 0 : i32
    return %c0_i32, %c0_i32_0, %c0_i32_1 : i32, i32, i32
  }
  func.func @transform_12(%arg0: i32) -> (i32, i32) {
    %c0_i32 = arith.constant 0 : i32
    %c0_i32_0 = arith.constant 0 : i32
    %c0_i32_1 = arith.constant 0 : i32
    return %c0_i32, %c0_i32_0 : i32, i32
  }
  func.func @transform_13(%arg0: i32) -> (i32, i32) {
    %c0_i32 = arith.constant 0 : i32
    %c0_i32_0 = arith.constant 0 : i32
    return %arg0, %c0_i32 : i32, i32
  }
}

</mosaic_0001>

<bundles_post_ra>
// kernel: squeeze.2
= control target key start
LH: loop header
LB: loop body
LE: loop exit
PB: predicated region body
PF: predicated region fallthrough
CT: control target
= control target key end

     0   :  { %s85_s0 = inlined_call_operand.vmem [shape: f32[16], index: 0, kind: input, shape index: {}]   ;;  %s86_s1 = inlined_call_operand.hbm [shape: f32[2,8], index: 1, kind: output, shape index: {}]  }
   0x1   :  { %v5_v0 = vld [vmem:[%s85_s0] sm:$0x1] }
   0x2   :  { %2 = vsyncpa [#allocation1], 0  ;;  %6 = vst [vmem:[#allocation3] sm:$0x1] %v5_v0  ;;  %vm8_vm0 = vcmask 64512   ;;  %s58_s0 = smov 120  }
   0x3   :  { %s59_s8 = smov [#allocation0]  }
   0x4   :  { %s26_s9 = sshll.u32 %s59_s8, 4  ;;  %s27_s9 = int_to_ptr.vmem [resolvable:$true] %s26_s9 }
   0x5   :  { %s34_s10 = scalar_lea.vmem %s27_s9, 32  ;;  %p39_p1 = scmp.lt.s32.totalorder %s27_s9, %s27_s9 }
   0x6   :  { %p35_p0 = scmp.ne.s32.totalorder %s27_s9, %s34_s10  ;;  %p40_p2 = scmp.lt.s32.totalorder %s34_s10, %s34_s10 }
   0x8   :  { %p41_p3 = por %p40_p2, %p39_p1 }
   0x9   :  { %v10_v1 = vld [vmem:[#allocation3] sm:$0x1]  }
   0xa   :  { %v7_v2 = vld [vmem:[#allocation3] sm:$0x1]   ;;  %11 = vrot.lane.b32.xlu0 %v10_v1, %s58_s0  ;;  %p42_p4 = pnand %p41_p3, %p35_p0 }
   0xb   :  { %9 = vst.msk [vmem:[#allocation2] sm:$0x1] %vm8_vm0, %v7_v2  }
  0x7c   :  { %v12_v3 = vpop.permute.xlu0 %11  }
  0x7d   :  { %15 = vst.msk [vmem:[#allocation2 + $0x1] sm:$0x1] %vm8_vm0, %v12_v3  }
  0x84   :  { %v19_v4 = vld [vmem:[#allocation2] sm:$0x3] }
  0x85   :  { %21 = vst [vmem:[#allocation0] sm:$0x3] %v19_v4 }
  0x86   :  { %45 = shalt.err (!%p42_p4)
}
  0x87   :  { %s46_s13 = scalar_lea.hbm %s86_s1, 32 }
  0x88   :  { %p47_p5 = scmp.ne.s32.totalorder %s86_s1, %s46_s13  ;;  %p50_p6 = scmp.lt.u32.totalorder %s46_s13, %s86_s1 }
  0x8a   :  { %p52_p7 = pnand %p50_p6, %p47_p5 }
  0x8c   :  { %55 = shalt.err (!%p52_p7)
}
  0x8d   :  { %29 = dma.vmem_to_hbm [thread:$0]  %s27_s9, 32, %s86_s1, [#allocation1]  }
  0x8e   :  { %56 = dma.done.wait [#allocation1], 32  }
  0x8f   :  { %57 = vsyncadd [#allocation1], 4294967264 }
  0x90   :  { %31 = vsyncpa [#allocation1], 1 }

// kernel: albert_highway_forward.1
= control target key start
LH: loop header
LB: loop body
LE: loop exit
PB: predicated region body
PF: predicated region fallthrough
CT: control target
= control target key end

     0   :  { %s3247_s25 = smov 0   ;;  %s3700_s0 = inlined_call_operand.vmem [shape: f32[16,16], index: 0, kind: input, shape index: {}]   ;;  %s3701_s1 = inlined_call_operand.vmem [shape: f32[2,1,8], index: 1, kind: input, shape index: {}]   ;;  %s3702_s2 = inlined_call_operand.vmem [shape: f32[14,128], index: 2, kind: input, shape index: {}]   ;;  %s3703_s3 = inlined_call_operand.vmem [shape: bf16[16,32], index: 3, kind: input, shape index: {}]   ;;  %s3704_s4 = inlined_call_operand.vmem [shape: bf16[4,32,8], index: 4, kind: input, shape index: {}]   ;;  %s3705_s5 = inlined_call_operand.vmem [shape: bf16[4,32,8], index: 5, kind: input, shape index: {}]   ;;  %s3706_s6 = inlined_call_operand.vmem [shape: bf16[4,32,8], index: 6, kind: input, shape index: {}]   ;;  %s3707_s7 = inlined_call_operand.vmem [shape: f32[3,4,1,8], index: 7, kind: input, shape index: {}]   ;;  %s3708_s8 = inlined_call_operand.vmem [shape: bf16[4,8,32], index: 8, kind: input, shape index: {}]   ;;  %s3709_s9 = inlined_call_operand.vmem [shape: bf16[32,64], index: 9, kind: input, shape index: {}]   ;;  %s3710_s10 = inlined_call_operand.vmem [shape: bf16[64,32], index: 10, kind: input, shape index: {}]   ;;  %s3711_s11 = inlined_call_operand.vmem [shape: bf16[3,32,64], index: 11, kind: input, shape index: {}]   ;;  %s3712_s12 = inlined_call_operand.vmem [shape: bf16[32,128], index: 12, kind: input, shape index: {}]   ;;  %s3713_s13 = inlined_call_operand.vmem [shape: f32[16,128], index: 13, kind: output, shape index: {}]  }
   0x1 LB: > { %s2567_s26 = sadd.s32 4294967295, %s3161_s25   ;;  %p2571_p0 = scmp.ge.s32.totalorder %s3161_s25, 1  ;;  %s3161_s25 = sphi %s3247_s25, %s23_s25  }
   0x2   : > { %p394_p1 = scmp.lt.s32.totalorder %s3161_s25, 3 }
   0x4   : > { %p395_p2 = pnand %p2571_p0, %p394_p1 }
   0x5   : > { %p439_p3 = scmp.lt.s32.totalorder (!%p395_p2), %s2567_s26, 1  ;;  %vm455_vm0 = vcmask (!%p395_p2), 130048   ;;  %v3072_v8 = vld [vmem:[%s3703_s3] sm:$0xff] (!%p395_p2)   ;;  %v3171_v9 = vmov (!%p395_p2), 0.0   ;;  %vm3172_vm1 = vmmov (!%p395_p2), 0   ;;  %s3288_s29 = smov (!%p395_p2), 0  }
   0x6   : > { %398 = sbr.rel (%p395_p2) target bundleno = 7332 (0x1ca4), region = 72  ;;  %2816 = vmatprep.subr.bf16.mxu0 (!%p395_p2), %v3171_v9  ;;  %2818 = vmatprep.mubr.msk.bf16.mxu0 (!%p395_p2), %vm3172_vm1, %v3171_v9  ;;  %v2574_v14 = vld [vmem:[%s3702_s2] ss:$0 sm:$0xff] (!%p395_p2)  ;;  %v2575_v16 = vld [vmem:[%s3702_s2 + $0x1] ss:$0 sm:$0xff] (!%p395_p2) }
   0x7   : > { %2817 = vmatpush3.bf16.msra.mxu0 (!%p395_p2), %v3072_v8  ;;  %v2576_v20 = vld [vmem:[%s3702_s2 + $0x2] ss:$0 sm:$0xff] (!%p395_p2) }
   0xd   : > { %s3716_s26 = smov (!%p439_p3, %s2567_s26), 1 }
   0xe   : > { %s2572_s27 = sshll.u32 %s3716_s26, 3  ;;  %s445_s30 = scalar_lea.vmem %s3701_s1, %s3716_s26 }
   0xf   : > { %s442_s16 = scalar_lea.vmem %s3700_s0, %s2572_s27  ;;  %s3264_s19 = scalar_lea.vmem %s3713_s13, %s2572_s27  ;;  %v3266_v0 = vld [vmem:[%s445_s30] ss:$0 sm:$0xff] }
  0x10   : > { %v452_v1 = vld [vmem:[%s442_s16] sm:$0xff] }
  0x11   : > { %v456_v2 = vsel %vm455_vm0, %v452_v1, 0.0 }
  0x12   : > { %457 = vadd.xlane.f32.xlu0 %v456_v2 }
  0x9f   : > { %v458_v3 = vpop.xlane.xlu0 %457 }
  0xa0   : > { %v460_v4 = vmul.f32 0.0625, %v458_v3 }
  0xa2   : > { %v461_v5 = vsub.f32 %v452_v1, %v460_v4 }
  0xa4   : > { %v462_v6 = vmul.f32 %v461_v5, %v461_v5 }
  0xa6   : > { %v463_v7 = vsel %vm455_vm0, %v462_v6, 0.0 }
  0xa7   : > { %464 = vadd.xlane.f32.xlu0 %v463_v7 }
 0x134   : > { %v465_v10 = vpop.xlane.xlu0 %464 }
 0x135   : > { %v466_v11 = vmul.f32 0.0625, %v465_v10 }
 0x137   : > { %v467_v12 = vadd.f32 1e-12, %v466_v11 }
 0x139   : > { %3073 = vrsqrt.f32 %v467_v12 }
 0x143   : > { %v3074_v13 = vpop.eup %3073 }
 0x144   : > { %v469_v15 = vmul.f32 %v3074_v13, %v461_v5 }
 0x146   : > { %v474_v17 = vmul.f32 %v2574_v14, %v469_v15 }
 0x148   : > { %v479_v18 = vadd.f32 %v2575_v16, %v474_v17 }
 0x14a   : > { %v482_v19 = vpack.c.bf16 %v479_v18, %v479_v18 }
 0x14c   : > { %2819 = vmatmul.mubr.msk.bf16.vlgmr.msra.gmra.mrb[0].mxu0 %vm455_vm0, %v482_v19 }
 0x21f   : > { %v531_v21 = vpop.f32.mrb[0].mxu0 }
 0x220   : > { %v532_v22 = vadd.f32 %v2576_v20, %v531_v21   ;;  %v2820_v23 = vpop.f32.mrb[1].mxu0 }
 0x221   : > { %v534_v24 = vpop.f32.mrb[2].mxu0 }
 0x222   : > { %v2821_v25 = vpop.f32.mrb[3].mxu0 }
 0x223 LB: >> { %v3075_v26 = vld [vmem:[%s3705_s5] sm:$0xff]   ;;  %v3173_v27 = vmov 0.0   ;;  %v3076_v28 = vld [vmem:[%s3705_s5 + $0x8] sm:$0xff]   ;;  %vm3174_vm2 = vmmov 0   ;;  %vm569_vm3 = vcmask 261120   ;;  %v3317_v31 = vpack.c.bf16 %v3165_v22, %v3165_v22  ;;  %v3083_v12 = vld [vmem:[%s3704_s4 + $0x10] sm:$0xff]   ;;  %s3169_s29 = sphi %s3288_s29, %s542_s29   ;;  %v3165_v22 = vphi %v532_v22, %v3714_v22  }
 0x224   : >> { %2830 = vmatprep.subr.bf16.mxu1 %v3173_v27  ;;  %2822 = vmatprep.subr.bf16.mxu0 %v3173_v27  ;;  %v3077_v29 = vld [vmem:[%s3704_s4] sm:$0xff]   ;;  %v3078_v30 = vld [vmem:[%s3704_s4 + $0x8] sm:$0xff]   ;;  %vm749_vm4 = vcmask 64512   ;;  %vm812_vm5 = vcmask 1043456   ;;  %v3084_v13 = vld [vmem:[%s3704_s4 + $0x18] sm:$0xff]   ;;  %vm2099_vm6 = vcmask 523264  }
 0x225   : >> { %2831 = vmatpush3.bf16.msra.mxu1 %v3075_v26  ;;  %2834 = vmatprep.mubr.msk.bf16.mxu1 %vm3174_vm2, %v3173_v27  ;;  %v2584_v32 = vld [vmem:[%s3707_s7 + $0x4] ss:$0 sm:$0xff]  ;;  %v2579_v37 = vld [vmem:[%s3707_s7] ss:$0 sm:$0xff]  ;;  %v3080_v48 = vld [vmem:[%s3706_s6 + $0x8] sm:$0xff]   ;;  %s542_s29 = sadd.s32 1, %s3169_s29  }
 0x226   : >> { %2832 = vmatprep.subr.bf16.mxu1 %v3173_v27  ;;  %2826 = vmatprep.mubr.msk.bf16.mxu0 %vm3174_vm2, %v3173_v27  ;;  %v3079_v47 = vld [vmem:[%s3706_s6] sm:$0xff]   ;;  %v2589_v63 = vld [vmem:[%s3707_s7 + $0x8] ss:$0 sm:$0xff]  ;;  %v3081_v15 = vld [vmem:[%s3705_s5 + $0x10] sm:$0xff]   ;;  %p539_p4 = scmp.ge.s32.totalorder %s542_s29, 2  }
 0x227   : >> { %2823 = vmatpush3.bf16.msra.mxu0 %v3077_v29  ;;  %v857_v5 = vld [vmem:[%s3708_s8] sm:$0xf]  ;;  %v3082_v20 = vld [vmem:[%s3705_s5 + $0x18] sm:$0xff]   ;;  %s3175_s16 = smov (%p539_p4), 32   ;;  %s3176_s17 = smov (%p539_p4), 96  }
 0x228   : >> { %2824 = vmatprep.subr.bf16.mxu0 %v3173_v27  ;;  %v862_v6 = vsel %vm812_vm5, %v857_v5, 0 }
 0x229   : >> { %2833 = vmatpush3.bf16.msra.mxu1 %v3076_v28 }
 0x22a   : >> { %2846 = vmatprep.subr.bf16.mxu1 %v3173_v27 }
 0x22b   : >> { %2825 = vmatpush3.bf16.msra.mxu0 %v3078_v30 }
 0x22c   : >> { %2835 = vmatmul.mubr.msk.bf16.vlgmr.msra.gmra.mrb[0].mxu1 %vm569_vm3, %v3317_v31  ;;  %2838 = vmatprep.subr.bf16.mxu0 %v3173_v27 }
 0x22d   : >> { %2848 = vmatprep.mubr.msk.bf16.mxu1 %vm3174_vm2, %v3173_v27 }
 0x22e   : >> { %2827 = vmatmul.mubr.msk.bf16.vlgmr.msra.gmra.mrb[0].mxu0 %vm569_vm3, %v3317_v31 }
 0x22f   : >> { %2842 = vmatprep.mubr.msk.bf16.mxu0 %vm3174_vm2, %v3173_v27  ;;  %2839 = vmatpush3.bf16.msra.mxu0 %v3079_v47 }
 0x230   : >> { %2840 = vmatprep.subr.bf16.mxu0 %v3173_v27 }
 0x233   : >> { %2841 = vmatpush3.bf16.msra.mxu0 %v3080_v48 }
 0x234   : >> { %2852 = vmatprep.subr.bf16.mxu0 %v3173_v27 }
 0x236   : >> { %2843 = vmatmul.mubr.msk.bf16.vlgmr.msra.gmra.mrb[4].mxu0 %vm569_vm3, %v3317_v31 }
 0x237   : >> { %2854 = vmatprep.mubr.msk.bf16.mxu0 %vm3174_vm2, %v3173_v27 }
 0x2ff   : >> { %v671_v33 = vpop.f32.mrb[0].mxu1 }
 0x300   : >> { %v672_v34 = vadd.f32 %v2584_v32, %v671_v33  ;;  %v2836_v35 = vpop.f32.mrb[1].mxu1  ;;  %v2612_v32 = vld [vmem:[%s3707_s7 + $0x5] ss:$0 sm:$0xff] }
 0x301   : >> { %v674_v36 = vpop.f32.mrb[2].mxu1  ;;  %v607_v38 = vpop.f32.mrb[0].mxu0 }
 0x302   : >> { %v742_v39 = vpack.c.bf16 %v672_v34, %v672_v34  ;;  %v2837_v40 = vpop.f32.mrb[3].mxu1  ;;  %v2828_v41 = vpop.f32.mrb[1].mxu0  ;;  %v608_v44 = vadd.f32 %v2579_v37, %v607_v38  ;;  %v2603_v37 = vld [vmem:[%s3707_s7 + $0x1] ss:$0 sm:$0xff] }
 0x303   : >> { %v610_v42 = vpop.f32.mrb[2].mxu0 }
 0x304   : >> { %v754_v43 = vsel %vm749_vm4, %v742_v39, 0  ;;  %v2829_v45 = vpop.f32.mrb[3].mxu0  ;;  %v741_v46 = vpack.c.bf16 %v608_v44, %v608_v44  ;;  %v3086_v44 = vld [vmem:[%s3706_s6 + $0x18] sm:$0xff]  }
 0x305   : >> { %2847 = vmatpush3.bf16.xpose.msra.mxu1 %v754_v43  ;;  %v3085_v43 = vld [vmem:[%s3706_s6 + $0x10] sm:$0xff]  }
 0x306   : >> { %2858 = vmatprep.subr.bf16.mxu1 %v3173_v27 }
 0x309   : >> { %v735_v60 = vpop.f32.mrb[4].mxu0 }
 0x30a   : >> { %v2844_v61 = vpop.f32.mrb[5].mxu0  ;;  %v736_v2 = vadd.f32 %v2589_v63, %v735_v60 }
 0x30b   : >> { %v738_v62 = vpop.f32.mrb[6].mxu0 }
 0x30c   : >> { %2849 = vmatmul.mubr.msk.bf16.vlgmr.msra.gmra.mrb[4].mxu1 %vm749_vm4, %v741_v46  ;;  %v2845_v1 = vpop.f32.mrb[7].mxu0  ;;  %v808_v3 = vpack.c.bf16 %v736_v2, %v736_v2 }
 0x30d   : >> { %2860 = vmatprep.mubr.msk.bf16.mxu1 %vm3174_vm2, %v3173_v27  ;;  %2859 = vmatpush3.bf16.msra.mxu1 %v862_v6  ;;  %v2627_v1 = vld [vmem:[%s3708_s8 + $0x4] sm:$0xf] }
 0x30e   : >> { %v814_v4 = vsel %vm812_vm5, %v808_v3, 0  ;;  %2872 = vmatprep.subr.bf16.mxu1 %v3173_v27  ;;  %v1218_v2 = vsel %vm812_vm5, %v2627_v1, 0 }
 0x30f   : >> { %2853 = vmatpush3.bf16.msra.mxu0 %v814_v4 }
 0x310   : >> { %2864 = vmatprep.subr.bf16.mxu0 %v3173_v27 }
 0x3df   : >> { %v790_v49 = vpop.f32.mrb[4].mxu1 }
 0x3e0   : >> { %v791_v50 = vadd.f32 %v3266_v0, %v790_v49  ;;  %v2850_v51 = vpop.f32.mrb[5].mxu1 }
 0x3e1   : >> { %v793_v52 = vpop.f32.mrb[6].mxu1 }
 0x3e2   : >> { %v2851_v53 = vpop.f32.mrb[7].mxu1  ;;  %v796_v54 = vsel %vm749_vm4, %v791_v50, -inf }
 0x3e3   : >> { %797 = vmax.xlane.f32.xlu0 %v796_v54 }
 0x470   : >> { %v798_v55 = vpop.xlane.xlu0 %797 }
 0x471   : >> { %v799_v56 = vsub.f32 %v791_v50, %v798_v55 }
 0x473   : >> { %v800_v57 = vmul.f32 1.442695, %v799_v56 }
 0x475   : >> { %3105 = vpow2.f32 %v800_v57 }
 0x47f   : >> { %v3106_v58 = vpop.eup %3105 }
 0x480   : >> { %v802_v59 = vsel %vm749_vm4, %v3106_v58, 0.0 }
 0x481   : >> { %803 = vadd.xlane.f32.xlu0 %v802_v59  ;;  %v2621_v59 = vld [vmem:[%s3707_s7 + $0x9] ss:$0 sm:$0xff] }
 0x50e   : >> { %v804_v7 = vpop.xlane.xlu0 %803 }
 0x50f   : >> { %3107 = vrcp.f32 %v804_v7  ;;  %v3089_v7 = vld [vmem:[%s3704_s4 + $0x20] sm:$0xff]  }
 0x519   : >> { %v3108_v8 = vpop.eup %3107 }
 0x51a   : >> { %v806_v10 = vmul.f32 %v3108_v8, %v3106_v58  ;;  %v3090_v8 = vld [vmem:[%s3704_s4 + $0x28] sm:$0xff]  }
 0x51c   : >> { %v807_v11 = vpack.c.bf16 %v806_v10, %v806_v10 }
 0x51e   : >> { %2855 = vmatmul.mubr.msk.bf16.vlgmr.msra.gmra.mrb[8].mxu0 %vm749_vm4, %v807_v11  ;;  %v3087_v11 = vld [vmem:[%s3705_s5 + $0x20] sm:$0xff]  }
 0x51f   : >> { %2868 = vmatprep.mubr.msk.bf16.mxu0 %vm3174_vm2, %v3173_v27  ;;  %2865 = vmatpush3.bf16.msra.mxu0 %v3083_v12 }
 0x520   : >> { %2866 = vmatprep.subr.bf16.mxu0 %v3173_v27 }
 0x523   : >> { %2867 = vmatpush3.bf16.msra.mxu0 %v3084_v13 }
 0x524   : >> { %2880 = vmatprep.subr.bf16.mxu0 %v3173_v27 }
 0x526   : >> { %2869 = vmatmul.mubr.msk.bf16.vlgmr.msra.gmra.mrb[12].mxu0 %vm569_vm3, %v3317_v31 }
 0x527   : >> { %2884 = vmatprep.mubr.msk.bf16.mxu0 %vm3174_vm2, %v3173_v27  ;;  %2881 = vmatpush3.bf16.msra.mxu0 %v3085_v43  ;;  %v3092_v43 = vld [vmem:[%s3706_s6 + $0x28] sm:$0xff]  }
 0x528   : >> { %2882 = vmatprep.subr.bf16.mxu0 %v3173_v27 }
 0x52b   : >> { %2883 = vmatpush3.bf16.msra.mxu0 %v3086_v44 }
 0x52c   : >> { %2894 = vmatprep.subr.bf16.mxu0 %v3173_v27 }
 0x52e   : >> { %2885 = vmatmul.mubr.msk.bf16.vlgmr.msra.gmra.mrb[16].mxu0 %vm569_vm3, %v3317_v31 }
 0x52f   : >> { %2896 = vmatprep.mubr.msk.bf16.mxu0 %vm3174_vm2, %v3173_v27 }
 0x5f1   : >> { %v850_v14 = vpop.f32.mrb[8].mxu0 }
 0x5f2   : >> { %v856_v16 = vpack.c.bf16 %v850_v14, %v850_v14  ;;  %v2856_v17 = vpop.f32.mrb[9].mxu0 }
 0x5f3   : >> { %v853_v18 = vpop.f32.mrb[10].mxu0 }
 0x5f4   : >> { %v2857_v19 = vpop.f32.mrb[11].mxu0  ;;  %2861 = vmatmul.mubr.msk.bf16.vlgmr.msra.gmra.mrb[8].mxu1 %vm749_vm4, %v856_v16  ;;  %v3088_v16 = vld [vmem:[%s3705_s5 + $0x28] sm:$0xff]  }
 0x5f5   : >> { %2873 = vmatpush3.bf16.msra.mxu1 %v3081_v15  ;;  %2876 = vmatprep.mubr.msk.bf16.mxu1 %vm3174_vm2, %v3173_v27 }
 0x5f6   : >> { %2874 = vmatprep.subr.bf16.mxu1 %v3173_v27 }
 0x5f9   : >> { %2875 = vmatpush3.bf16.msra.mxu1 %v3082_v20  ;;  %v968_v21 = vpop.f32.mrb[12].mxu0 }
 0x5fa   : >> { %2888 = vmatprep.subr.bf16.mxu1 %v3173_v27  ;;  %v2870_v23 = vpop.f32.mrb[13].mxu0  ;;  %v969_v41 = vadd.f32 %v2603_v37, %v968_v21  ;;  %v2597_v21 = vld [vmem:[%s3702_s2 + $0x3] ss:$0 sm:$0xff]  ;;  %v2634_v37 = vld [vmem:[%s3707_s7 + $0x2] ss:$0 sm:$0xff] }
 0x5fb   : >> { %v971_v24 = vpop.f32.mrb[14].mxu0 }
 0x5fc   : >> { %2877 = vmatmul.mubr.msk.bf16.vlgmr.msra.gmra.mrb[12].mxu1 %vm569_vm3, %v3317_v31  ;;  %v2871_v25 = vpop.f32.mrb[15].mxu0  ;;  %v1104_v42 = vpack.c.bf16 %v969_v41, %v969_v41 }
 0x5fd   : >> { %2890 = vmatprep.mubr.msk.bf16.mxu1 %vm3174_vm2, %v3173_v27 }
 0x601   : >> { %v1098_v56 = vpop.f32.mrb[16].mxu0 }
 0x602   : >> { %v2886_v57 = vpop.f32.mrb[17].mxu0  ;;  %v1099_v61 = vadd.f32 %v2621_v59, %v1098_v56 }
 0x603   : >> { %v1101_v58 = vpop.f32.mrb[18].mxu0 }
 0x604   : >> { %v2887_v60 = vpop.f32.mrb[19].mxu0  ;;  %v1164_v62 = vpack.c.bf16 %v1099_v61, %v1099_v61  ;;  %v2652_v58 = vld [vmem:[%s3707_s7 + $0xa] ss:$0 sm:$0xff] }
 0x606   : >> { %v1169_v63 = vsel %vm812_vm5, %v1164_v62, 0 }
 0x607   : >> { %2895 = vmatpush3.bf16.msra.mxu0 %v1169_v63  ;;  %v2658_v63 = vld [vmem:[%s3708_s8 + $0x8] sm:$0xf] }
 0x608   : >> { %2906 = vmatprep.subr.bf16.mxu0 %v3173_v27  ;;  %v1570_v1 = vsel %vm812_vm5, %v2658_v63, 0 }
 0x6c7   : >> { %v3396_v26 = vpop.f32.mrb[8].mxu1 }
 0x6c8   : >> { %v2862_v28 = vpop.f32.mrb[9].mxu1  ;;  %v908_v23 = vadd.f32 %v2597_v21, %v3396_v26 }
 0x6c9   : >> { %v901_v29 = vpop.f32.mrb[10].mxu1 }
 0x6ca   : >> { %v2863_v30 = vpop.f32.mrb[11].mxu1 }
 0x6cf   : >> { %v1033_v33 = vpop.f32.mrb[12].mxu1 }
 0x6d0   : >> { %v1034_v34 = vadd.f32 %v2612_v32, %v1033_v33  ;;  %v2878_v35 = vpop.f32.mrb[13].mxu1  ;;  %v2643_v32 = vld [vmem:[%s3707_s7 + $0x6] ss:$0 sm:$0xff] }
 0x6d1   : >> { %v1036_v36 = vpop.f32.mrb[14].mxu1 }
 0x6d2   : >> { %v1105_v38 = vpack.c.bf16 %v1034_v34, %v1034_v34  ;;  %v2879_v39 = vpop.f32.mrb[15].mxu1 }
 0x6d4   : >> { %v1110_v40 = vsel %vm749_vm4, %v1105_v38, 0 }
 0x6d5   : >> { %2889 = vmatpush3.bf16.xpose.msra.mxu1 %v1110_v40 }
 0x6d6   : >> { %2900 = vmatprep.subr.bf16.mxu1 %v3173_v27 }
 0x6dc   : >> { %2891 = vmatmul.mubr.msk.bf16.vlgmr.msra.gmra.mrb[16].mxu1 %vm749_vm4, %v1104_v42  ;;  %v3091_v42 = vld [vmem:[%s3706_s6 + $0x20] sm:$0xff]  }
 0x6dd   : >> { %2902 = vmatprep.mubr.msk.bf16.mxu1 %vm3174_vm2, %v3173_v27  ;;  %2901 = vmatpush3.bf16.msra.mxu1 %v1218_v2 }
 0x6de   : >> { %2914 = vmatprep.subr.bf16.mxu1 %v3173_v27 }
 0x7af   : >> { %v1146_v45 = vpop.f32.mrb[16].mxu1 }
 0x7b0   : >> { %v1147_v46 = vadd.f32 %v3266_v0, %v1146_v45  ;;  %v2892_v47 = vpop.f32.mrb[17].mxu1 }
 0x7b1   : >> { %v1149_v48 = vpop.f32.mrb[18].mxu1 }
 0x7b2   : >> { %v2893_v49 = vpop.f32.mrb[19].mxu1  ;;  %v1152_v50 = vsel %vm749_vm4, %v1147_v46, -inf }
 0x7b3   : >> { %1153 = vmax.xlane.f32.xlu1 %v1152_v50 }
 0x840   : >> { %v1154_v51 = vpop.xlane.xlu1 %1153 }
 0x841   : >> { %v1155_v52 = vsub.f32 %v1147_v46, %v1154_v51 }
 0x843   : >> { %v1156_v53 = vmul.f32 1.442695, %v1155_v52 }
 0x845   : >> { %3109 = vpow2.f32 %v1156_v53 }
 0x84f   : >> { %v3110_v54 = vpop.eup %3109 }
 0x850   : >> { %v1158_v55 = vsel %vm749_vm4, %v3110_v54, 0.0 }
 0x851   : >> { %1159 = vadd.xlane.f32.xlu1 %v1158_v55 }
 0x8de   : >> { %v1160_v3 = vpop.xlane.xlu1 %1159 }
 0x8df   : >> { %3111 = vrcp.f32 %v1160_v3 }
 0x8e9   : >> { %v3112_v4 = vpop.eup %3111 }
 0x8ea   : >> { %v1162_v5 = vmul.f32 %v3112_v4, %v3110_v54 }
 0x8ec   : >> { %v1163_v6 = vpack.c.bf16 %v1162_v5, %v1162_v5 }
 0x8ee   : >> { %2897 = vmatmul.mubr.msk.bf16.vlgmr.msra.gmra.mrb[20].mxu0 %vm749_vm4, %v1163_v6  ;;  %v3095_v6 = vld [vmem:[%s3704_s4 + $0x30] sm:$0xff]  }
 0x8ef   : >> { %2910 = vmatprep.mubr.msk.bf16.mxu0 %vm3174_vm2, %v3173_v27  ;;  %2907 = vmatpush3.bf16.msra.mxu0 %v3089_v7  ;;  %v3096_v7 = vld [vmem:[%s3704_s4 + $0x38] sm:$0xff]  }
 0x8f0   : >> { %2908 = vmatprep.subr.bf16.mxu0 %v3173_v27 }
 0x8f3   : >> { %2909 = vmatpush3.bf16.msra.mxu0 %v3090_v8 }
 0x8f4   : >> { %2922 = vmatprep.subr.bf16.mxu0 %v3173_v27 }
 0x8f6   : >> { %2911 = vmatmul.mubr.msk.bf16.vlgmr.msra.gmra.mrb[24].mxu0 %vm569_vm3, %v3317_v31 }
 0x8f7   : >> { %2926 = vmatprep.mubr.msk.bf16.mxu0 %vm3174_vm2, %v3173_v27  ;;  %2923 = vmatpush3.bf16.msra.mxu0 %v3091_v42 }
 0x8f8   : >> { %2924 = vmatprep.subr.bf16.mxu0 %v3173_v27 }
 0x8fb   : >> { %2925 = vmatpush3.bf16.msra.mxu0 %v3092_v43 }
 0x8fc   : >> { %2936 = vmatprep.subr.bf16.mxu0 %v3173_v27 }
 0x8fe   : >> { %2927 = vmatmul.mubr.msk.bf16.vlgmr.msra.gmra.mrb[28].mxu0 %vm569_vm3, %v3317_v31 }
 0x8ff   : >> { %2938 = vmatprep.mubr.msk.bf16.mxu0 %vm3174_vm2, %v3173_v27 }
 0x9c1   : >> { %v1205_v10 = vpop.f32.mrb[20].mxu0 }
 0x9c2   : >> { %v1211_v12 = vpack.c.bf16 %v1205_v10, %v1205_v10  ;;  %v2898_v13 = vpop.f32.mrb[21].mxu0  ;;  %v3093_v10 = vld [vmem:[%s3705_s5 + $0x30] sm:$0xff]  }
 0x9c3   : >> { %v1208_v14 = vpop.f32.mrb[22].mxu0 }
 0x9c4   : >> { %v2899_v15 = vpop.f32.mrb[23].mxu0  ;;  %2903 = vmatmul.mubr.msk.bf16.vlgmr.msra.gmra.mrb[20].mxu1 %vm749_vm4, %v1211_v12 }
 0x9c5   : >> { %2915 = vmatpush3.bf16.msra.mxu1 %v3087_v11  ;;  %2918 = vmatprep.mubr.msk.bf16.mxu1 %vm3174_vm2, %v3173_v27  ;;  %v3094_v15 = vld [vmem:[%s3705_s5 + $0x38] sm:$0xff]  }
 0x9c6   : >> { %2916 = vmatprep.subr.bf16.mxu1 %v3173_v27 }
 0x9c9   : >> { %2917 = vmatpush3.bf16.msra.mxu1 %v3088_v16  ;;  %v1320_v17 = vpop.f32.mrb[24].mxu0 }
 0x9ca   : >> { %2930 = vmatprep.subr.bf16.mxu1 %v3173_v27  ;;  %v2912_v18 = vpop.f32.mrb[25].mxu0  ;;  %v1321_v40 = vadd.f32 %v2634_v37, %v1320_v17 }
 0x9cb   : >> { %v1323_v19 = vpop.f32.mrb[26].mxu0 }
 0x9cc   : >> { %2919 = vmatmul.mubr.msk.bf16.vlgmr.msra.gmra.mrb[24].mxu1 %vm569_vm3, %v3317_v31  ;;  %v2913_v20 = vpop.f32.mrb[27].mxu0  ;;  %v1456_v41 = vpack.c.bf16 %v1321_v40, %v1321_v40  ;;  %v3098_v40 = vld [vmem:[%s3706_s6 + $0x38] sm:$0xff]  }
 0x9cd   : >> { %2932 = vmatprep.mubr.msk.bf16.mxu1 %vm3174_vm2, %v3173_v27 }
 0x9d1   : >> { %v1450_v55 = vpop.f32.mrb[28].mxu0 }
 0x9d2   : >> { %v2928_v56 = vpop.f32.mrb[29].mxu0  ;;  %v1451_v60 = vadd.f32 %v2652_v58, %v1450_v55 }
 0x9d3   : >> { %v1453_v57 = vpop.f32.mrb[30].mxu0 }
 0x9d4   : >> { %v2929_v59 = vpop.f32.mrb[31].mxu0  ;;  %v1516_v61 = vpack.c.bf16 %v1451_v60, %v1451_v60 }
 0x9d5   : >> { %v2689_v59 = vld [vmem:[%s3708_s8 + $0xc] sm:$0xf] }
 0x9d6   : >> { %v1521_v62 = vsel %vm812_vm5, %v1516_v61, 0  ;;  %v1922_v60 = vsel %vm812_vm5, %v2689_v59, 0 }
 0x9d7   : >> { %2937 = vmatpush3.bf16.msra.mxu0 %v1521_v62 }
 0x9d8   : >> { %2948 = vmatprep.subr.bf16.mxu0 %v3173_v27 }
 0xa97   : >> { %v1254_v24 = vpop.f32.mrb[20].mxu1 }
 0xa98   : >> { %v3468_v25 = vadd.f32 %v1254_v24, %v908_v23  ;;  %v2904_v28 = vpop.f32.mrb[21].mxu1 }
 0xa99   : >> { %v1257_v29 = vpop.f32.mrb[22].mxu1 }
 0xa9a   : >> { %v2905_v30 = vpop.f32.mrb[23].mxu1  ;;  %v2674_v29 = vld [vmem:[%s3707_s7 + $0x7] ss:$0 sm:$0xff] }
 0xa9f   : >> { %v1385_v33 = vpop.f32.mrb[24].mxu1 }
 0xaa0   : >> { %v1386_v34 = vadd.f32 %v2643_v32, %v1385_v33  ;;  %v2920_v35 = vpop.f32.mrb[25].mxu1 }
 0xaa1   : >> { %v1388_v36 = vpop.f32.mrb[26].mxu1  ;;  %v2665_v35 = vld [vmem:[%s3707_s7 + $0x3] ss:$0 sm:$0xff] }
 0xaa2   : >> { %v1457_v38 = vpack.c.bf16 %v1386_v34, %v1386_v34  ;;  %v2921_v26 = vpop.f32.mrb[27].mxu1 }
 0xaa4   : >> { %v1462_v39 = vsel %vm749_vm4, %v1457_v38, 0 }
 0xaa5   : >> { %2931 = vmatpush3.bf16.xpose.msra.mxu1 %v1462_v39  ;;  %v3097_v39 = vld [vmem:[%s3706_s6 + $0x30] sm:$0xff]  }
 0xaa6   : >> { %2942 = vmatprep.subr.bf16.mxu1 %v3173_v27 }
 0xaac   : >> { %2933 = vmatmul.mubr.msk.bf16.vlgmr.msra.gmra.mrb[28].mxu1 %vm749_vm4, %v1456_v41 }
 0xaad   : >> { %2944 = vmatprep.mubr.msk.bf16.mxu1 %vm3174_vm2, %v3173_v27  ;;  %2943 = vmatpush3.bf16.msra.mxu1 %v1570_v1 }
 0xaae   : >> { %2956 = vmatprep.subr.bf16.mxu1 %v3173_v27 }
 0xb7f   : >> { %v1498_v44 = vpop.f32.mrb[28].mxu1 }
 0xb80   : >> { %v1499_v45 = vadd.f32 %v3266_v0, %v1498_v44  ;;  %v2934_v46 = vpop.f32.mrb[29].mxu1 }
 0xb81   : >> { %v1501_v47 = vpop.f32.mrb[30].mxu1 }
 0xb82   : >> { %v2935_v48 = vpop.f32.mrb[31].mxu1  ;;  %v1504_v49 = vsel %vm749_vm4, %v1499_v45, -inf }
 0xb83   : >> { %1505 = vmax.xlane.f32.xlu0 %v1504_v49 }
 0xc10   : >> { %v1506_v50 = vpop.xlane.xlu0 %1505 }
 0xc11   : >> { %v1507_v51 = vsub.f32 %v1499_v45, %v1506_v50 }
 0xc13   : >> { %v1508_v52 = vmul.f32 1.442695, %v1507_v51 }
 0xc15   : >> { %3113 = vpow2.f32 %v1508_v52 }
 0xc1f   : >> { %v3114_v53 = vpop.eup %3113 }
 0xc20   : >> { %v1510_v54 = vsel %vm749_vm4, %v3114_v53, 0.0 }
 0xc21   : >> { %1511 = vadd.xlane.f32.xlu1 %v1510_v54  ;;  %v2683_v54 = vld [vmem:[%s3707_s7 + $0xb] ss:$0 sm:$0xff] }
 0xcae   : >> { %v1512_v2 = vpop.xlane.xlu1 %1511 }
 0xcaf   : >> { %3115 = vrcp.f32 %v1512_v2 }
 0xcb9   : >> { %v3116_v3 = vpop.eup %3115 }
 0xcba   : >> { %v1514_v4 = vmul.f32 %v3116_v3, %v3114_v53 }
 0xcbc   : >> { %v1515_v5 = vpack.c.bf16 %v1514_v4, %v1514_v4 }
 0xcbe   : >> { %2939 = vmatmul.mubr.msk.bf16.vlgmr.msra.gmra.mrb[32].mxu0 %vm749_vm4, %v1515_v5 }
 0xcbf   : >> { %2952 = vmatprep.mubr.msk.bf16.mxu0 %vm3174_vm2, %v3173_v27  ;;  %2949 = vmatpush3.bf16.msra.mxu0 %v3095_v6 }
 0xcc0   : >> { %2950 = vmatprep.subr.bf16.mxu0 %v3173_v27 }
 0xcc3   : >> { %2951 = vmatpush3.bf16.msra.mxu0 %v3096_v7 }
 0xcc4   : >> { %2964 = vmatprep.subr.bf16.mxu0 %v3173_v27 }
 0xcc6   : >> { %2953 = vmatmul.mubr.msk.bf16.vlgmr.msra.gmra.mrb[36].mxu0 %vm569_vm3, %v3317_v31 }
 0xcc7   : >> { %2968 = vmatprep.mubr.msk.bf16.mxu0 %vm3174_vm2, %v3173_v27  ;;  %2965 = vmatpush3.bf16.msra.mxu0 %v3097_v39 }
 0xcc8   : >> { %2966 = vmatprep.subr.bf16.mxu0 %v3173_v27 }
 0xccb   : >> { %2967 = vmatpush3.bf16.msra.mxu0 %v3098_v40 }
 0xccc   : >> { %2978 = vmatprep.subr.bf16.mxu0 %v3173_v27 }
 0xcce   : >> { %2969 = vmatmul.mubr.msk.bf16.vlgmr.msra.gmra.mrb[40].mxu0 %vm569_vm3, %v3317_v31 }
 0xccf   : >> { %2980 = vmatprep.mubr.msk.bf16.mxu0 %vm3174_vm2, %v3173_v27 }
 0xd91   : >> { %v1557_v8 = vpop.f32.mrb[32].mxu0 }
 0xd92   : >> { %v1563_v11 = vpack.c.bf16 %v1557_v8, %v1557_v8  ;;  %v2940_v12 = vpop.f32.mrb[33].mxu0 }
 0xd93   : >> { %v1560_v13 = vpop.f32.mrb[34].mxu0 }
 0xd94   : >> { %v2941_v14 = vpop.f32.mrb[35].mxu0  ;;  %2945 = vmatmul.mubr.msk.bf16.vlgmr.msra.gmra.mrb[32].mxu1 %vm749_vm4, %v1563_v11 }
 0xd95   : >> { %2957 = vmatpush3.bf16.msra.mxu1 %v3093_v10  ;;  %2960 = vmatprep.mubr.msk.bf16.mxu1 %vm3174_vm2, %v3173_v27 }
 0xd96   : >> { %2958 = vmatprep.subr.bf16.mxu1 %v3173_v27 }
 0xd99   : >> { %2959 = vmatpush3.bf16.msra.mxu1 %v3094_v15  ;;  %v1672_v16 = vpop.f32.mrb[36].mxu0 }
 0xd9a   : >> { %2972 = vmatprep.subr.bf16.mxu1 %v3173_v27  ;;  %v2954_v17 = vpop.f32.mrb[37].mxu0  ;;  %v1673_v38 = vadd.f32 %v2665_v35, %v1672_v16 }
 0xd9b   : >> { %v1675_v18 = vpop.f32.mrb[38].mxu0 }
 0xd9c   : >> { %2961 = vmatmul.mubr.msk.bf16.vlgmr.msra.gmra.mrb[36].mxu1 %vm569_vm3, %v3317_v31  ;;  %v2955_v19 = vpop.f32.mrb[39].mxu0  ;;  %v1808_v26 = vpack.c.bf16 %v1673_v38, %v1673_v38  ;;  %v3104_v38 = vld [vmem:[%s3710_s10 + $0x18] sm:$0xff]  }
 0xd9d   : >> { %2974 = vmatprep.mubr.msk.bf16.mxu1 %vm3174_vm2, %v3173_v27 }
 0xda1   : >> { %v1802_v31 = vpop.f32.mrb[40].mxu0 }
 0xda2   : >> { %v2970_v52 = vpop.f32.mrb[41].mxu0  ;;  %v1803_v56 = vadd.f32 %v2683_v54, %v1802_v31 }
 0xda3   : >> { %v1805_v53 = vpop.f32.mrb[42].mxu0 }
 0xda4   : >> { %v2971_v55 = vpop.f32.mrb[43].mxu0  ;;  %v1868_v57 = vpack.c.bf16 %v1803_v56, %v1803_v56  ;;  %v2702_v53 = vld [vmem:[%s3702_s2 + $0x7] ss:$0 sm:$0xff] }
 0xda6   : >> { %v1873_v58 = vsel %vm812_vm5, %v1868_v57, 0 }
 0xda7   : >> { %2979 = vmatpush3.bf16.msra.mxu0 %v1873_v58 }
 0xda8   : >> { %2990 = vmatprep.subr.bf16.mxu0 %v3173_v27 }
 0xe67   : >> { %v1606_v20 = vpop.f32.mrb[32].mxu1 }
 0xe68   : >> { %v3537_v21 = vadd.f32 %v1606_v20, %v3468_v25  ;;  %v2946_v23 = vpop.f32.mrb[33].mxu1  ;;  %v3099_v20 = vld [vmem:[%s3709_s9] sm:$0xff]  }
 0xe69   : >> { %v1609_v24 = vpop.f32.mrb[34].mxu1 }
 0xe6a   : >> { %v2947_v28 = vpop.f32.mrb[35].mxu1 }
 0xe6f   : >> { %v1737_v30 = vpop.f32.mrb[36].mxu1 }
 0xe70   : >> { %v1738_v32 = vadd.f32 %v2674_v29, %v1737_v30  ;;  %v2962_v33 = vpop.f32.mrb[37].mxu1  ;;  %v2691_v29 = vld [vmem:[%s3702_s2 + $0x4] ss:$0 sm:$0xff] }
 0xe71   : >> { %v1740_v34 = vpop.f32.mrb[38].mxu1 }
 0xe72   : >> { %v1809_v36 = vpack.c.bf16 %v1738_v32, %v1738_v32  ;;  %v2963_v37 = vpop.f32.mrb[39].mxu1  ;;  %v2692_v32 = vld [vmem:[%s3702_s2 + $0x5] ss:$0 sm:$0xff] }
 0xe73   : >> { %v3102_v37 = vld [vmem:[%s3710_s10 + $0x8] sm:$0xff]  }
 0xe74   : >> { %v1814_v25 = vsel %vm749_vm4, %v1809_v36, 0  ;;  %v3101_v36 = vld [vmem:[%s3710_s10] sm:$0xff]  }
 0xe75   : >> { %2973 = vmatpush3.bf16.xpose.msra.mxu1 %v1814_v25  ;;  %v3103_v25 = vld [vmem:[%s3710_s10 + $0x10] sm:$0xff]  }
 0xe76   : >> { %2984 = vmatprep.subr.bf16.mxu1 %v3173_v27 }
 0xe7c   : >> { %2975 = vmatmul.mubr.msk.bf16.vlgmr.msra.gmra.mrb[40].mxu1 %vm749_vm4, %v1808_v26  ;;  %v2693_v26 = vld [vmem:[%s3702_s2 + $0x6] ss:$0 sm:$0xff] }
 0xe7d   : >> { %2986 = vmatprep.mubr.msk.bf16.mxu1 %vm3174_vm2, %v3173_v27  ;;  %2985 = vmatpush3.bf16.msra.mxu1 %v1922_v60 }
 0xe7e   : >> { %2998 = vmatprep.subr.bf16.mxu1 %v3173_v27 }
 0xf4f   : >> { %v1850_v41 = vpop.f32.mrb[40].mxu1 }
 0xf50   : >> { %v1851_v42 = vadd.f32 %v3266_v0, %v1850_v41  ;;  %v2976_v43 = vpop.f32.mrb[41].mxu1 }
 0xf51   : >> { %v1853_v44 = vpop.f32.mrb[42].mxu1 }
 0xf52   : >> { %v2977_v45 = vpop.f32.mrb[43].mxu1  ;;  %v1856_v46 = vsel %vm749_vm4, %v1851_v42, -inf }
 0xf53   : >> { %1857 = vmax.xlane.f32.xlu0 %v1856_v46 }
 0xfe0   : >> { %v1858_v47 = vpop.xlane.xlu0 %1857 }
 0xfe1   : >> { %v1859_v48 = vsub.f32 %v1851_v42, %v1858_v47 }
 0xfe3   : >> { %v1860_v49 = vmul.f32 1.442695, %v1859_v48 }
 0xfe5   : >> { %3117 = vpow2.f32 %v1860_v49 }
 0xfef   : >> { %v3118_v50 = vpop.eup %3117 }
 0xff0   : >> { %v1862_v51 = vsel %vm749_vm4, %v3118_v50, 0.0 }
 0xff1   : >> { %1863 = vadd.xlane.f32.xlu1 %v1862_v51 }
0x107e   : >> { %v1864_v61 = vpop.xlane.xlu1 %1863 }
0x107f   : >> { %3119 = vrcp.f32 %v1864_v61 }
0x1089   : >> { %v3120_v62 = vpop.eup %3119 }
0x108a   : >> { %v1866_v63 = vmul.f32 %v3120_v62, %v3118_v50 }
0x108c   : >> { %v1867_v1 = vpack.c.bf16 %v1866_v63, %v1866_v63 }
0x108e   : >> { %2981 = vmatmul.mubr.msk.bf16.vlgmr.msra.gmra.mrb[44].mxu0 %vm749_vm4, %v1867_v1 }
0x108f   : >> { %2994 = vmatprep.mubr.msk.bf16.mxu0 %vm3174_vm2, %v3173_v27  ;;  %2991 = vmatpush3.bf16.msra.mxu0 %v3099_v20 }
0x1090   : >> { %2992 = vmatprep.subr.bf16.mxu0 %v3173_v27 }
0x1161   : >> { %v1909_v2 = vpop.f32.mrb[44].mxu0 }
0x1162   : >> { %v1915_v3 = vpack.c.bf16 %v1909_v2, %v1909_v2  ;;  %v2982_v4 = vpop.f32.mrb[45].mxu0 }
0x1163   : >> { %v1912_v5 = vpop.f32.mrb[46].mxu0 }
0x1164   : >> { %v2983_v6 = vpop.f32.mrb[47].mxu0  ;;  %2987 = vmatmul.mubr.msk.bf16.vlgmr.msra.gmra.mrb[44].mxu1 %vm749_vm4, %v1915_v3 }
0x1165   : >> { %3006 = vmatprep.mubr.msk.bf16.mxu1 %vm3174_vm2, %v3173_v27  ;;  %2999 = vmatpush3.bf16.msra.mxu1 %v3101_v36  ;;  %v2703_v6 = vld [vmem:[%s3702_s2 + $0x8] ss:$0 sm:$0xff] }
0x1166   : >> { %3000 = vmatprep.subr.bf16.mxu1 %v3173_v27 }
0x1169   : >> { %3001 = vmatpush3.bf16.msra.mxu1 %v3102_v37 }
0x116a   : >> { %3002 = vmatprep.subr.bf16.mxu1 %v3173_v27 }
0x116d   : >> { %3003 = vmatpush3.bf16.msra.mxu1 %v3103_v25 }
0x116e   : >> { %3004 = vmatprep.subr.bf16.mxu1 %v3173_v27 }
0x1171   : >> { %3005 = vmatpush3.bf16.msra.mxu1 %v3104_v38  ;;  %v2714_v38 = vld [vmem:[%s3702_s2 + $0xc] ss:$0 sm:$0xff] (%p539_p4) }
0x1172   : > { %3018 = vmatprep.subr.bf16.mxu1 (%p539_p4), %v3171_v9 }
0x1237   : >> { %v1958_v7 = vpop.f32.mrb[44].mxu1 }
0x1238   : >> { %v1964_v8 = vadd.f32 %v1958_v7, %v3537_v21  ;;  %v2988_v10 = vpop.f32.mrb[45].mxu1 }
0x1239   : >> { %v1961_v11 = vpop.f32.mrb[46].mxu1 }
0x123a   : >> { %v2989_v12 = vpop.f32.mrb[47].mxu1  ;;  %v1965_v13 = vadd.f32 %v3165_v22, %v1964_v8  ;;  %v3100_v22 = vld [vmem:[%s3709_s9 + $0x8] sm:$0xff]  }
0x123b   : >> { %2993 = vmatpush3.bf16.msra.mxu0 %v3100_v22  ;;  %v2704_v8 = vld [vmem:[%s3702_s2 + $0x9] ss:$0 sm:$0xff]  ;;  %v3127_v12 = vld [vmem:[%s3711_s11] sm:$0xff] (%p539_p4)  }
0x123c   : >> { %v1968_v14 = vsel %vm569_vm3, %v1965_v13, 0.0  ;;  %3010 = vmatprep.subr.bf16.mxu0 (%p539_p4), %v3171_v9 }
0x123d   : >> { %1969 = vadd.xlane.f32.xlu0 %v1968_v14  ;;  %v2705_v14 = vld [vmem:[%s3702_s2 + $0xb] ss:$0 sm:$0xff] (%p539_p4) }
0x12ca   : >> { %v1970_v15 = vpop.xlane.xlu0 %1969 }
0x12cb   : >> { %v1972_v16 = vmul.f32 0.03125, %v1970_v15 }
0x12cd   : >> { %v1973_v17 = vsub.f32 %v1965_v13, %v1972_v16  ;;  %v3128_v13 = vld [vmem:[%s3711_s11 + $0x8] sm:$0xff] (%p539_p4)  }
0x12cf   : >> { %v1974_v18 = vmul.f32 %v1973_v17, %v1973_v17 }
0x12d1   : >> { %v1975_v19 = vsel %vm569_vm3, %v1974_v18, 0.0 }
0x12d2   : >> { %1976 = vadd.xlane.f32.xlu1 %v1975_v19  ;;  %v3129_v19 = vld [vmem:[%s3711_s11 + $0x10] sm:$0xff] (%p539_p4)  }
0x135f   : >> { %v1977_v21 = vpop.xlane.xlu1 %1976 }
0x1360   : >> { %v1978_v23 = vmul.f32 0.03125, %v1977_v21  ;;  %v3130_v21 = vld [vmem:[%s3711_s11 + $0x18] sm:$0xff] (%p539_p4)  }
0x1362   : >> { %v1979_v24 = vadd.f32 1e-12, %v1978_v23 }
0x1364   : >> { %3121 = vrsqrt.f32 %v1979_v24 }
0x136e   : >> { %v3122_v28 = vpop.eup %3121 }
0x136f   : >> { %v1981_v30 = vmul.f32 %v3122_v28, %v1973_v17 }
0x1371   : >> { %v1986_v33 = vmul.f32 %v2691_v29, %v1981_v30 }
0x1373   : >> { %v1991_v34 = vadd.f32 %v2692_v32, %v1986_v33 }
0x1375   : >> { %v1996_v35 = vpack.c.bf16 %v1991_v34, %v1991_v34 }
0x1377   : >> { %2995 = vmatmul.mubr.msk.bf16.vlgmr.msra.gmra.mrb[48].mxu0 %vm569_vm3, %v1996_v35 }
0x1378   : > { %3014 = vmatprep.mubr.msk.bf16.mxu0 (%p539_p4), %vm3172_vm1, %v3171_v9  ;;  %3011 = vmatpush3.bf16.msra.mxu0 (%p539_p4), %v3127_v12  ;;  %v2728_v12 = vld [vmem:[%s3702_s2 + $0xa] ss:$0 sm:$0xff] (%p539_p4) }
0x1379   : > { %3012 = vmatprep.subr.bf16.mxu0 (%p539_p4), %v3171_v9 }
0x137c   : > { %3013 = vmatpush3.bf16.msra.mxu0 (%p539_p4), %v3128_v13 }
0x137d   : > { %3026 = vmatprep.subr.bf16.mxu0 (%p539_p4), %v3171_v9 }
0x144a   : >> { %v2051_v39 = vpop.f32.mrb[48].mxu0 }
0x144b   : >> { %v2052_v40 = vadd.f32 %v2693_v26, %v2051_v39  ;;  %v2996_v41 = vpop.f32.mrb[49].mxu0  ;;  %v3131_v26 = vld [vmem:[%s3711_s11 + $0x20] sm:$0xff] (%p539_p4)  }
0x144c   : >> { %v2054_v42 = vpop.f32.mrb[50].mxu0 }
0x144d   : >> { %v2057_v43 = vmul.f32 %v2052_v40, %v2052_v40  ;;  %v2997_v44 = vpop.f32.mrb[51].mxu0 }
0x144f   : >> { %v2058_v45 = vmul.f32 %v2057_v43, %v2052_v40 }
0x1451   : >> { %v2059_v46 = vmul.f32 0.044715, %v2058_v45 }
0x1453   : >> { %v2060_v47 = vadd.f32 %v2059_v46, %v2052_v40 }
0x1455   : >> { %v2061_v48 = vmul.f32 0.7978846, %v2060_v47 }
0x1457   : >> { %3123 = vtanh.f32 %v2061_v48 }
0x1461   : >> { %v3124_v27 = vpop.eup %3123 }
0x1462   : >> { %v2063_v49 = vadd.f32 1.0, %v3124_v27 }
0x1464   : >> { %v2064_v50 = vmul.f32 0.5, %v2063_v49 }
0x1466   : >> { %v2065_v51 = vmul.f32 %v2064_v50, %v2052_v40  ;;  %v3132_v40 = vld [vmem:[%s3711_s11 + $0x28] sm:$0xff] (%p539_p4)  }
0x1468   : >> { %v2074_v31 = vpack.c.bf16 %v2065_v51, %v2065_v51 }
0x146a   : >> { %3007 = vmatmul.mubr.msk.bf16.vlgmr.msra.gmra.mrb[48].mxu1 %vm2099_vm6, %v2074_v31 }
0x146b   : > { %3022 = vmatprep.mubr.msk.bf16.mxu1 (%p539_p4), %vm3172_vm1, %v3171_v9  ;;  %3019 = vmatpush3.bf16.msra.mxu1 (%p539_p4), %v3129_v19 }
0x146c   : > { %3020 = vmatprep.subr.bf16.mxu1 (%p539_p4), %v3171_v9 }
0x146f   : > { %3021 = vmatpush3.bf16.msra.mxu1 (%p539_p4), %v3130_v21 }
0x1470   : > { %3034 = vmatprep.subr.bf16.mxu1 (%p539_p4), %v3171_v9 }
0x153d   : >> { %v2137_v52 = vpop.f32.mrb[48].mxu1 }
0x153e   : >> { %v2143_v54 = vadd.f32 %v2137_v52, %v1991_v34  ;;  %v3008_v55 = vpop.f32.mrb[49].mxu1 }
0x153f   : >> { %v2140_v56 = vpop.f32.mrb[50].mxu1  ;;  %v2723_v55 = vld [vmem:[%s3702_s2 + $0xd] ss:$0 sm:$0xff] (%p539_p4) }
0x1540   : >> { %v3009_v57 = vpop.f32.mrb[51].mxu1  ;;  %v2149_v58 = vadd.f32 %v2702_v53, %v2143_v54  ;;  %v3133_v56 = vld [vmem:[%s3712_s12] sm:$0xff] (%p539_p4)  }
0x1542   : >> { %v2152_v59 = vsel %vm569_vm3, %v2149_v58, 0.0 }
0x1543   : >> { %2153 = vadd.xlane.f32.xlu0 %v2152_v59 }
0x15d0   : >> { %v2154_v60 = vpop.xlane.xlu0 %2153 }
0x15d1   : >> { %v2155_v61 = vmul.f32 0.03125, %v2154_v60 }
0x15d3   : >> { %v2156_v62 = vsub.f32 %v2149_v58, %v2155_v61  ;;  %v3134_v58 = vld [vmem:[%s3712_s12 + $0x8] sm:$0xff] (%p539_p4)  }
0x15d5   : >> { %v2157_v63 = vmul.f32 %v2156_v62, %v2156_v62 }
0x15d7   : >> { %v2158_v1 = vsel %vm569_vm3, %v2157_v63, 0.0 }
0x15d8   : >> { %2159 = vadd.xlane.f32.xlu1 %v2158_v1 }
0x1665   : >> { %v2160_v2 = vpop.xlane.xlu1 %2159 }
0x1666   : >> { %v2161_v3 = vmul.f32 0.03125, %v2160_v2 }
0x1668   : >> { %v2162_v4 = vadd.f32 1e-12, %v2161_v3 }
0x166a   : >> { %3125 = vrsqrt.f32 %v2162_v4 }
0x1674   : >> { %v3126_v5 = vpop.eup %3125 }
0x1675   : >> { %v2164_v7 = vmul.f32 %v3126_v5, %v2156_v62  ;;  %541 = sbr.rel (!%p539_p4) target bundleno = 547 (0x223), region = 137 }
0x1677   : >> { %v2169_v10 = vmul.f32 %v2703_v6, %v2164_v7 }
0x1679   : >> { %v2174_v11 = vadd.f32 %v2704_v8, %v2169_v10  }
0x167b   : >> { %v3714_v22 = vmov %v2174_v11  ;;  %v2179_v0 = vpack.c.bf16 (%p539_p4), %v2174_v11, %v2174_v11 }
0x167d   : > { %3015 = vmatmul.mubr.msk.bf16.vlgmr.msra.gmra.mrb[0].mxu0 %vm569_vm3, %v2179_v0 }
0x167e   : > { %3030 = vmatprep.mubr.msk.bf16.mxu0 %vm3172_vm1, %v3171_v9  ;;  %3027 = vmatpush3.bf16.msra.mxu0 %v3131_v26 }
0x167f   : > { %3028 = vmatprep.subr.bf16.mxu0 %v3171_v9 }
0x1682   : > { %3029 = vmatpush3.bf16.msra.mxu0 %v3132_v40 }
0x1750   : > { %v2235_v15 = vpop.f32.mrb[0].mxu0 }
0x1751   : > { %v2236_v16 = vadd.f32 %v2705_v14, %v2235_v15  ;;  %v3016_v17 = vpop.f32.mrb[1].mxu0 }
0x1752   : > { %v2238_v18 = vpop.f32.mrb[2].mxu0 }
0x1753   : > { %v3017_v20 = vpop.f32.mrb[3].mxu0  ;;  %v2241_v22 = vmax.f32 %v2236_v16, 0.0  ;;  %v2709_v23 = vmul.f32 -1.442695, %v2236_v16 }
0x1755   : > { %2249 = vrot.lane.b32.xlu0 %v2241_v22, %s3175_s16  ;;  %3135 = vpow2.f32 %v2709_v23 }
0x1759   : > { %2255 = vrot.lane.b32.xlu0 %v2174_v11, %s3175_s16 }
0x175f   : > { %v3136_v24 = vpop.eup %3135 }
0x1760   : > { %v2245_v28 = vadd.f32 1.0, %v3136_v24 }
0x1762   : > { %3137 = vrcp.f32 %v2245_v28 }
0x176c   : > { %v3138_v29 = vpop.eup %3137 }
0x176d   : > { %v2253_v32 = vsub.f32 1.0, %v3138_v29 }
0x17c7   : > { %v2250_v30 = vpop.permute.xlu0 %2249 }
0x17c8   : > { %v2252_v34 = vmul.f32 %v3138_v29, %v2250_v30 }
0x17cb   : > { %v2256_v33 = vpop.permute.xlu0 %2255 }
0x17cc   : > { %v2258_v35 = vmul.f32 %v2256_v33, %v2253_v32 }
0x17ce   : > { %v2259_v36 = vadd.f32 %v2258_v35, %v2252_v34 }
0x17d0   : > { %v2265_v37 = vpack.c.bf16 %v2259_v36, %v2259_v36 }
0x17d2   : > { %2272 = vrot.lane.b32.xlu1 %v2265_v37, %s3176_s17 }
0x1844   : > { %v2273_v25 = vpop.permute.xlu1 %2272 }
0x1845   : > { %3023 = vmatmul.mubr.msk.bf16.vlgmr.msra.gmra.mrb[0].mxu1 %vm569_vm3, %v2273_v25 }
0x1846   : > { %3038 = vmatprep.mubr.msk.bf16.mxu1 %vm3172_vm1, %v3171_v9  ;;  %3035 = vmatpush3.bf16.msra.mxu1 %v3133_v56 }
0x1847   : > { %3036 = vmatprep.subr.bf16.mxu1 %v3171_v9 }
0x184a   : > { %3037 = vmatpush3.bf16.msra.mxu1 %v3134_v58 }
0x1918   : > { %v2323_v39 = vpop.f32.mrb[0].mxu1 }
0x1919   : > { %v2324_v41 = vadd.f32 %v2714_v38, %v2323_v39  ;;  %v3024_v42 = vpop.f32.mrb[1].mxu1 }
0x191a   : > { %v2326_v43 = vpop.f32.mrb[2].mxu1 }
0x191b   : > { %v2329_v44 = vmax.f32 %v2324_v41, 0.0  ;;  %v3025_v45 = vpop.f32.mrb[3].mxu1  ;;  %v2718_v46 = vmul.f32 -1.442695, %v2324_v41 }
0x191d   : > { %2337 = vrot.lane.b32.xlu1 %v2329_v44, %s3175_s16  ;;  %3139 = vpow2.f32 %v2718_v46 }
0x1927   : > { %v3140_v47 = vpop.eup %3139 }
0x1928   : > { %v2333_v48 = vadd.f32 1.0, %v3140_v47 }
0x192a   : > { %3141 = vrcp.f32 %v2333_v48 }
0x1934   : > { %v3142_v27 = vpop.eup %3141 }
0x1935   : > { %v2341_v49 = vsub.f32 1.0, %v3142_v27 }
0x1937   : > { %v2342_v51 = vmul.f32 %v2341_v49, %v2259_v36 }
0x198f   : > { %v2338_v50 = vpop.permute.xlu1 %2337 }
0x1990   : > { %v2340_v31 = vmul.f32 %v3142_v27, %v2338_v50 }
0x1992   : > { %v2343_v52 = vadd.f32 %v2342_v51, %v2340_v31 }
0x1994   : > { %v2349_v53 = vpack.c.bf16 %v2343_v52, %v2343_v52 }
0x1996   : > { %2356 = vrot.lane.b32.xlu0 %v2349_v53, %s3176_s17 }
0x1a08   : > { %v2357_v54 = vpop.permute.xlu0 %2356 }
0x1a09   : > { %3031 = vmatmul.mubr.msk.bf16.vlgmr.msra.gmra.mrb[4].mxu0 %vm569_vm3, %v2357_v54 }
0x1adc   : > { %v2407_v57 = vpop.f32.mrb[4].mxu0 }
0x1add   : > { %v2408_v59 = vadd.f32 %v2723_v55, %v2407_v57  ;;  %v3032_v60 = vpop.f32.mrb[5].mxu0 }
0x1ade   : > { %v2410_v61 = vpop.f32.mrb[6].mxu0 }
0x1adf   : > { %v2413_v62 = vmax.f32 %v2408_v59, 0.0  ;;  %v3033_v63 = vpop.f32.mrb[7].mxu0  ;;  %v2727_v1 = vmul.f32 -1.442695, %v2408_v59 }
0x1ae1   : > { %2421 = vrot.lane.b32.xlu1 %v2413_v62, %s3175_s16  ;;  %3143 = vpow2.f32 %v2727_v1 }
0x1aeb   : > { %v3144_v2 = vpop.eup %3143 }
0x1aec   : > { %v2417_v3 = vadd.f32 1.0, %v3144_v2 }
0x1aee   : > { %3145 = vrcp.f32 %v2417_v3 }
0x1af8   : > { %v3146_v4 = vpop.eup %3145 }
0x1af9   : > { %v2425_v5 = vsub.f32 1.0, %v3146_v4 }
0x1afb   : > { %v2426_v7 = vmul.f32 %v2425_v5, %v2343_v52 }
0x1b53   : > { %v2422_v6 = vpop.permute.xlu1 %2421 }
0x1b54   : > { %v2424_v8 = vmul.f32 %v3146_v4, %v2422_v6 }
0x1b56   : > { %v2427_v10 = vadd.f32 %v2426_v7, %v2424_v8 }
0x1b58   : > { %v2432_v11 = vpack.c.bf16 %v2427_v10, %v2427_v10 }
0x1b5a   : > { %2439 = vrot.lane.b32.xlu0 %v2432_v11, %s3176_s17 }
0x1bcc   : > { %v2440_v9 = vpop.permute.xlu0 %2439 }
0x1bcd   : > { %3039 = vmatmul.mubr.msk.bf16.vlgmr.msra.gmra.mrb[4].mxu1 %vm569_vm3, %v2440_v9 }
0x1ca0   : > { %v2490_v13 = vpop.f32.mrb[4].mxu1 }
0x1ca1   : > { %v2491_v0 = vadd.f32 %v2728_v12, %v2490_v13  ;;  %v3040_v14 = vpop.f32.mrb[5].mxu1 }
0x1ca2   : > { %v2493_v15 = vpop.f32.mrb[6].mxu1 }
0x1ca3   : > { %2496 = vst [vmem:[%s3264_s19] sm:$0xff] %v2491_v0  ;;  %v3041_v16 = vpop.f32.mrb[7].mxu1 }
0x1ca4 PF: > { %s23_s25 = sadd.s32 1, %s3161_s25  }
0x1ca5   : > { %p20_p5 = scmp.ge.s32.totalorder %s23_s25, 4  }
0x1ca7   :  { %22 = sbr.rel (!%p20_p5) target bundleno = 1 (0x1), region = 148 }

</bundles_post_ra>
